<compile_context>
chip_gen: v7x
topology: tpu7x:2x2x1
jax: 0.10.0
libtpu: 0.0.40
codegen_flags: <defaults>
</compile_context>

<pallas_src>
from functools import partial

import jax
import jax.numpy as jnp
from jax.experimental import pallas as pl
from jax.experimental.pallas import tpu as pltpu


def _attention_head_kernel(x_ref, wqkv_ref, wout_ref, b_ref, o_ref, acc_ref,
                           *, dim_head, scale, mxu_dtype):
    h = pl.program_id(1)
    d = dim_head

    @pl.when(h == 0)
    def _init():
        acc_ref[...] = jnp.zeros_like(acc_ref)

    x = x_ref[0]                                    # (C, S) channels-major
    wqkv_h = wqkv_ref[0]                            # (3*d, C): this head's q/k/v rows

    # to_qkv (1x1 conv == channel-mix matmul), restricted to this head's output channels.
    qkv = jnp.dot(wqkv_h.astype(mxu_dtype), x.astype(mxu_dtype),
                  preferred_element_type=jnp.float32)               # (3*d, S)
    q = qkv[0:d, :]
    k = qkv[d:2 * d, :]
    v = qkv[2 * d:3 * d, :]

    # F.normalize(dim=-1) on 'b h c (x y)' => l2 norm over spatial positions (lane axis).
    # Attention scale is folded into q's normalization (free: rides on the 1/norm multiply).
    q_norm = jnp.maximum(jnp.sqrt(jnp.sum(q * q, axis=-1, keepdims=True)), 1e-12)
    k_norm = jnp.maximum(jnp.sqrt(jnp.sum(k * k, axis=-1, keepdims=True)), 1e-12)
    qn = q * (scale / q_norm)                                       # (d, S)
    kn = k * (1.0 / k_norm)                                         # (d, S)

    # sim[i, j] = scale * <q_i, k_j>: contraction over dim 0 of BOTH operands
    # (transposed-LHS MXU matmul — no explicit qn.T materialization / XLU transpose pass).
    sim = jax.lax.dot_general(qn.astype(mxu_dtype), kn.astype(mxu_dtype),
                              (((0,), (0,)), ((), ())),
                              preferred_element_type=jnp.float32)   # (S, S)

    # Numerically stable softmax; row normalization deferred past attn@v so we only rescale an
    # (S, d) tile instead of dividing the (S, S) matrix (and drop one S^2 f32 temporary).
    sim = sim - jnp.max(sim, axis=-1, keepdims=True)
    p = jnp.exp(sim)                                                # (S, S), f32 elementwise
    denom = jnp.sum(p, axis=-1, keepdims=True)                      # (S, 1)

    # out_un[i, d] = sum_j p[i, j] * v[d, j]   (rhs-transposed MXU dot)
    out_un = jax.lax.dot_general(p.astype(mxu_dtype), v.astype(mxu_dtype),
                                 (((1,), (1,)), ((), ())),
                                 preferred_element_type=jnp.float32)  # (S, d)
    out_sd = out_un * pl.reciprocal(denom, approx=True)               # (S, d), EUP reciprocal

    # to_out contribution of this head: acc[c, s] += sum_d Wout[c, h*d + d'] * out[s, d'].
    wout_h = wout_ref[0]                                              # (C, d)
    acc_ref[...] += jax.lax.dot_general(wout_h.astype(mxu_dtype), out_sd.astype(mxu_dtype),
                                        (((1,), (1,)), ((), ())),
                                        preferred_element_type=jnp.float32)  # (C, S)

    @pl.when(h == pl.num_programs(1) - 1)
    def _finalize():
        y = acc_ref[...] + b_ref[...].astype(jnp.float32)             # bias (C,1) bcast over lanes
        o_ref[0] = y.astype(o_ref.dtype)                              # lane-dense (C, S) store


def attention_forward(x, w_qkv, w_out, b_out, *, heads, dim_head, scale=10.0, mxu_dtype=None):
    """x: (B, C, H, W); w_qkv: (3*heads*dim_head, C); w_out: (C, heads*dim_head); b_out: (C,).

    mxu_dtype: dtype used for MXU matmul operands (element-wise math stays f32).
    Pass jnp.bfloat16 on v6e/v7x for full MXU throughput; defaults to x.dtype.
    """
    B, C, H, W = x.shape
    hidden = heads * dim_head
    assert w_qkv.shape == (3 * hidden, C)
    assert w_out.shape == (C, hidden)
    assert b_out.shape == (C,)
    S = H * W
    if mxu_dtype is None:
        mxu_dtype = x.dtype

    x3 = x.reshape(B, C, S)          # NCHW is already channels-major: free reshape

    # Regroup to_qkv rows per head: (3, heads, d, C) -> (heads, 3*d, C).  One-time, tiny.
    wqkv_h = (w_qkv.reshape(3, heads, dim_head, C)
              .transpose(1, 0, 2, 3)
              .reshape(heads, 3 * dim_head, C))
    # Per-head column slices of to_out: (C, heads, d) -> (heads, C, d).
    wout_h = w_out.reshape(C, heads, dim_head).transpose(1, 0, 2)
    b2 = b_out.reshape(C, 1)

    out3 = pl.pallas_call(
        partial(_attention_head_kernel, dim_head=dim_head, scale=float(scale),
                mxu_dtype=mxu_dtype),
        out_shape=jax.ShapeDtypeStruct((B, C, S), x.dtype),
        grid_spec=pltpu.PrefetchScalarGridSpec(
            num_scalar_prefetch=0,
            grid=(B, heads),                         # heads = accumulation axis (last, "arbitrary")
            in_specs=[
                pl.BlockSpec((1, C, S), lambda b, h: (b, 0, 0)),             # x: resident per image
                pl.BlockSpec((1, 3 * dim_head, C), lambda b, h: (h, 0, 0)),  # this head's qkv rows
                pl.BlockSpec((1, C, dim_head), lambda b, h: (h, 0, 0)),      # this head's to_out cols
                pl.BlockSpec((C, 1), lambda b, h: (0, 0)),                   # to_out bias (resident)
            ],
            out_specs=pl.BlockSpec((1, C, S), lambda b, h: (b, 0, 0)),
            scratch_shapes=[pltpu.VMEM((C, S), jnp.float32)],                # f32 y accumulator
        ),
        compiler_params=pltpu.CompilerParams(
            dimension_semantics=("parallel", "arbitrary"),
        ),
    )(x3, wqkv_h, wout_h, b2)

    return out3.reshape(B, C, H, W)


def attention_reference(x, w_qkv, w_out, b_out, *, heads, dim_head, scale=10.0):
    """Pure-JAX reference matching the PyTorch Attention.forward."""
    B, C, H, W = x.shape
    hidden = heads * dim_head
    S = H * W
    hp = jax.lax.Precision.HIGHEST

    x3 = x.reshape(B, C, S).astype(jnp.float32)
    qkv = jnp.einsum("oc,bcs->bos", w_qkv.astype(jnp.float32), x3, precision=hp)
    q, k, v = jnp.split(qkv, 3, axis=1)
    q = q.reshape(B, heads, dim_head, S)        # 'b (h c) x y -> b h c (x y)'
    k = k.reshape(B, heads, dim_head, S)
    v = v.reshape(B, heads, dim_head, S)

    def l2norm(t):
        n = jnp.sqrt(jnp.sum(t * t, axis=-1, keepdims=True))
        return t / jnp.maximum(n, 1e-12)        # F.normalize(dim=-1)

    q = l2norm(q)
    k = l2norm(k)
    sim = jnp.einsum("bhdi,bhdj->bhij", q, k, precision=hp) * scale
    attn = jax.nn.softmax(sim, axis=-1)
    out = jnp.einsum("bhij,bhdj->bhid", attn, v, precision=hp)                 # (B, h, S, d)
    out = jnp.transpose(out, (0, 1, 3, 2)).reshape(B, hidden, S)               # 'b h i d -> b (h d) i'
    y = jnp.einsum("oc,bcs->bos", w_out.astype(jnp.float32), out, precision=hp)
    y = y + b_out.astype(jnp.float32).reshape(1, C, 1)
    return y.reshape(B, C, H, W).astype(x.dtype)


if __name__ == "__main__":
    key = jax.random.PRNGKey(0)
    kx, kq, ko, kb = jax.random.split(key, 4)

    B, C, H, W = 2, 4, 16, 16
    heads, dim_head, scale = 4, 32, 10.0
    hidden = heads * dim_head

    x = jax.random.normal(kx, (B, C, H, W), dtype=jnp.float32)
    # to_qkv: Conv2d(dim, hidden*3, 1, bias=False)  -> weight (3*hidden, C)
    w_qkv = jax.random.normal(kq, (3 * hidden, C), dtype=jnp.float32) * 0.2
    # to_out: Conv2d(hidden, dim, 1)                -> weight (C, hidden), bias (C,)
    w_out = jax.random.normal(ko, (C, hidden), dtype=jnp.float32) * 0.1
    b_out = jax.random.normal(kb, (C,), dtype=jnp.float32) * 0.1

    ref = attention_reference(x, w_qkv, w_out, b_out, heads=heads, dim_head=dim_head, scale=scale)

    # f32 MXU path (matches module numerics).
    out = attention_forward(x, w_qkv, w_out, b_out, heads=heads, dim_head=dim_head, scale=scale)
    out = jax.block_until_ready(out)
    assert out.shape == (B, C, H, W)
    max_err = float(jnp.max(jnp.abs(out - ref)))
    assert jnp.allclose(out, ref, atol=2e-3, rtol=2e-3), f"f32 mismatch, max_abs_err={max_err}"

    # bf16 MXU-operand path (recommended on v6e/v7x; element-wise math stays f32).
    out_bf16 = attention_forward(x, w_qkv, w_out, b_out, heads=heads, dim_head=dim_head,
                                 scale=scale, mxu_dtype=jnp.bfloat16)
    out_bf16 = jax.block_until_ready(out_bf16)
    max_err_bf16 = float(jnp.max(jnp.abs(out_bf16 - ref)))
    assert jnp.allclose(out_bf16, ref, atol=2e-2, rtol=2e-2), \
        f"bf16 mismatch, max_abs_err={max_err_bf16}"

    print("KERNEL_OK")
</pallas_src>

<mosaic_0001>
module attributes {stable_mosaic.version = 11 : i64} {
  func.func @_attention_head_kernel(%arg0: i32, %arg1: i32, %arg2: memref<1x4x256xf32, #tpu.memory_space<vmem>>, %arg3: memref<1x96x4xf32, #tpu.memory_space<vmem>>, %arg4: memref<1x4x32xf32, #tpu.memory_space<vmem>>, %arg5: memref<4x1xf32, #tpu.memory_space<vmem>>, %arg6: memref<1x4x256xf32, #tpu.memory_space<vmem>>, %arg7: memref<4x256xf32, #tpu.memory_space<vmem>>) attributes {dimension_semantics = [#tpu.dimension_semantics<parallel>, #tpu.dimension_semantics<arbitrary>], iteration_bounds = array<i64: 2, 4>, scalar_prefetch = 0 : i64, scratch_operands = 1 : i64, tpu.core_type = #tpu.core_type<tc>, window_params = [{transform_indices = @transform_0, window_bounds = array<i64: 1, 4, 256>}, {transform_indices = @transform_1, window_bounds = array<i64: 1, 96, 4>}, {transform_indices = @transform_2, window_bounds = array<i64: 1, 4, 32>}, {pipeline_mode = #tpu.pipeline_mode<synchronous>, transform_indices = @transform_3, window_bounds = array<i64: 4, 1>}, {transform_indices = @transform_4, window_bounds = array<i64: 1, 4, 256>}]} {
    %c0_i32 = arith.constant 0 : i32
    %0 = arith.cmpi eq, %arg1, %c0_i32 : i32
    %1 = arith.extui %0 : i1 to i32
    %c0_i32_0 = arith.constant 0 : i32
    %2 = arith.cmpi ne, %1, %c0_i32_0 : i32
    scf.if %2 {
      %cst_25 = arith.constant 0.000000e+00 : f32
      %52 = vector.broadcast %cst_25 : f32 to vector<4x256xf32>
      %c0_26 = arith.constant 0 : index
      %c0_27 = arith.constant 0 : index
      %53 = vector.load %arg7[%c0_26, %c0_27] : memref<4x256xf32, #tpu.memory_space<vmem>>, vector<4x256xf32>
      tpu.vector_store %arg7[%c0_26, %c0_27], %52 {strides = array<i32>} : memref<4x256xf32, #tpu.memory_space<vmem>>, vector<4x256xf32>,
    } else {
    }
    %c0 = arith.constant 0 : index
    %c0_1 = arith.constant 0 : index
    %c0_2 = arith.constant 0 : index
    %3 = vector.load %arg2[%c0, %c0_1, %c0_2] : memref<1x4x256xf32, #tpu.memory_space<vmem>>, vector<1x4x256xf32>
    %4 = vector.shape_cast %3 : vector<1x4x256xf32> to vector<4x256xf32>
    %c0_3 = arith.constant 0 : index
    %c0_4 = arith.constant 0 : index
    %c0_5 = arith.constant 0 : index
    %5 = vector.load %arg3[%c0_3, %c0_4, %c0_5] : memref<1x96x4xf32, #tpu.memory_space<vmem>>, vector<1x96x4xf32>
    %6 = vector.shape_cast %5 : vector<1x96x4xf32> to vector<96x4xf32>
    %cst = arith.constant dense<0.000000e+00> : vector<96x256xf32>
    %7 = tpu.matmul %6, %4, %cst {dimension_numbers = #tpu.dot_dimension_numbers<[1], [0], [0], [1], [0, 0, 1, 1], [], []>} : vector<96x4xf32>, vector<4x256xf32>, vector<96x256xf32> -> vector<96x256xf32>
    %8 = vector.extract_strided_slice %7 {offsets = [0, 0], sizes = [32, 256], strides = [1, 1]} : vector<96x256xf32> to vector<32x256xf32>
    %9 = vector.extract_strided_slice %7 {offsets = [32, 0], sizes = [32, 256], strides = [1, 1]} : vector<96x256xf32> to vector<32x256xf32>
    %10 = vector.extract_strided_slice %7 {offsets = [64, 0], sizes = [32, 256], strides = [1, 1]} : vector<96x256xf32> to vector<32x256xf32>
    %11 = arith.mulf %8, %8 : vector<32x256xf32>
    %cst_6 = arith.constant dense<0.000000e+00> : vector<32xf32>
    %12 = vector.multi_reduction <add>, %11, %cst_6 [1] : vector<32x256xf32> to vector<32xf32>
    %13 = vector.shape_cast %12 : vector<32xf32> to vector<32x1xf32>
    %14 = math.sqrt %13 : vector<32x1xf32>
    %cst_7 = arith.constant 9.99999996E-13 : f32
    %15 = vector.broadcast %cst_7 : f32 to vector<32x1xf32>
    %16 = arith.maximumf %14, %15 : vector<32x1xf32>
    %17 = arith.mulf %9, %9 : vector<32x256xf32>
    %cst_8 = arith.constant dense<0.000000e+00> : vector<32xf32>
    %18 = vector.multi_reduction <add>, %17, %cst_8 [1] : vector<32x256xf32> to vector<32xf32>
    %19 = vector.shape_cast %18 : vector<32xf32> to vector<32x1xf32>
    %20 = math.sqrt %19 : vector<32x1xf32>
    %cst_9 = arith.constant 9.99999996E-13 : f32
    %21 = vector.broadcast %cst_9 : f32 to vector<32x1xf32>
    %22 = arith.maximumf %20, %21 : vector<32x1xf32>
    %cst_10 = arith.constant 1.000000e+01 : f32
    %23 = vector.broadcast %cst_10 : f32 to vector<32x1xf32>
    %24 = arith.divf %23, %16 : vector<32x1xf32>
    %25 = vector.broadcast %24 : vector<32x1xf32> to vector<32x256xf32>
    %26 = arith.mulf %8, %25 : vector<32x256xf32>
    %cst_11 = arith.constant 1.000000e+00 : f32
    %27 = vector.broadcast %cst_11 : f32 to vector<32x1xf32>
    %28 = arith.divf %27, %22 : vector<32x1xf32>
    %29 = vector.broadcast %28 : vector<32x1xf32> to vector<32x256xf32>
    %30 = arith.mulf %9, %29 : vector<32x256xf32>
    %cst_12 = arith.constant dense<0.000000e+00> : vector<256x256xf32>
    %31 = tpu.matmul %26, %30, %cst_12 {dimension_numbers = #tpu.dot_dimension_numbers<[0], [0], [1], [1], [0, 1, 1, 1], [], []>} : vector<32x256xf32>, vector<32x256xf32>, vector<256x256xf32> -> vector<256x256xf32>
    %cst_13 = arith.constant dense<0xFF800000> : vector<256xf32>
    %32 = vector.multi_reduction <maximumf>, %31, %cst_13 [1] : vector<256x256xf32> to vector<256xf32>
    %33 = vector.shape_cast %32 : vector<256xf32> to vector<256x1xf32>
    %34 = vector.broadcast %33 : vector<256x1xf32> to vector<256x256xf32>
    %35 = arith.subf %31, %34 : vector<256x256xf32>
    %36 = math.exp %35 : vector<256x256xf32>
    %cst_14 = arith.constant dense<0.000000e+00> : vector<256xf32>
    %37 = vector.multi_reduction <add>, %36, %cst_14 [1] : vector<256x256xf32> to vector<256xf32>
    %38 = vector.shape_cast %37 : vector<256xf32> to vector<256x1xf32>
    %cst_15 = arith.constant dense<0.000000e+00> : vector<256x32xf32>
    %39 = tpu.matmul %36, %10, %cst_15 {dimension_numbers = #tpu.dot_dimension_numbers<[1], [1], [0], [0], [0, 0, 1, 0], [], []>} : vector<256x256xf32>, vector<32x256xf32>, vector<256x32xf32> -> vector<256x32xf32>
    %40 = tpu.reciprocal %38 {approx = true} : vector<256x1xf32> -> vector<256x1xf32>
    %41 = vector.broadcast %40 : vector<256x1xf32> to vector<256x32xf32>
    %42 = arith.mulf %39, %41 : vector<256x32xf32>
    %c0_16 = arith.constant 0 : index
    %c0_17 = arith.constant 0 : index
    %c0_18 = arith.constant 0 : index
    %43 = vector.load %arg4[%c0_16, %c0_17, %c0_18] : memref<1x4x32xf32, #tpu.memory_space<vmem>>, vector<1x4x32xf32>
    %44 = vector.shape_cast %43 : vector<1x4x32xf32> to vector<4x32xf32>
    %c0_19 = arith.constant 0 : index
    %c0_20 = arith.constant 0 : index
    %45 = vector.load %arg7[%c0_19, %c0_20] : memref<4x256xf32, #tpu.memory_space<vmem>>, vector<4x256xf32>
    %cst_21 = arith.constant dense<0.000000e+00> : vector<4x256xf32>
    %46 = tpu.matmul %44, %42, %cst_21 {dimension_numbers = #tpu.dot_dimension_numbers<[1], [1], [0], [0], [0, 0, 1, 0], [], []>} : vector<4x32xf32>, vector<256x32xf32>, vector<4x256xf32> -> vector<4x256xf32>
    %47 = arith.addf %45, %46 : vector<4x256xf32>
    %c0_22 = arith.constant 0 : index
    %c0_23 = arith.constant 0 : index
    %48 = vector.load %arg7[%c0_22, %c0_23] : memref<4x256xf32, #tpu.memory_space<vmem>>, vector<4x256xf32>
    tpu.vector_store %arg7[%c0_22, %c0_23], %47 {strides = array<i32>} : memref<4x256xf32, #tpu.memory_space<vmem>>, vector<4x256xf32>,
    %c3_i32 = arith.constant 3 : i32
    %49 = arith.cmpi eq, %arg1, %c3_i32 : i32
    %50 = arith.extui %49 : i1 to i32
    %c0_i32_24 = arith.constant 0 : i32
    %51 = arith.cmpi ne, %50, %c0_i32_24 : i32
    scf.if %51 {
      %c0_25 = arith.constant 0 : index
      %c0_26 = arith.constant 0 : index
      %52 = vector.load %arg7[%c0_25, %c0_26] : memref<4x256xf32, #tpu.memory_space<vmem>>, vector<4x256xf32>
      %c0_27 = arith.constant 0 : index
      %c0_28 = arith.constant 0 : index
      %53 = vector.load %arg5[%c0_27, %c0_28] : memref<4x1xf32, #tpu.memory_space<vmem>>, vector<4x1xf32>
      %54 = vector.broadcast %53 : vector<4x1xf32> to vector<4x256xf32>
      %55 = arith.addf %52, %54 : vector<4x256xf32>
      %c0_29 = arith.constant 0 : index
      %c0_30 = arith.constant 0 : index
      %c0_31 = arith.constant 0 : index
      %56 = vector.load %arg6[%c0_29, %c0_30, %c0_31] : memref<1x4x256xf32, #tpu.memory_space<vmem>>, vector<1x4x256xf32>
      %57 = vector.shape_cast %56 : vector<1x4x256xf32> to vector<4x256xf32>
      %58 = vector.shape_cast %55 : vector<4x256xf32> to vector<1x4x256xf32>
      tpu.vector_store %arg6[%c0_29, %c0_30, %c0_31], %58 {strides = array<i32>} : memref<1x4x256xf32, #tpu.memory_space<vmem>>, vector<1x4x256xf32>,
    } else {
    }
    return
  }
  func.func @transform_0(%arg0: i32, %arg1: i32) -> (i32, i32, i32) {
    %c0_i32 = arith.constant 0 : i32
    %c0_i32_0 = arith.constant 0 : i32
    %c0_i32_1 = arith.constant 0 : i32
    return %arg0, %c0_i32, %c0_i32_0 : i32, i32, i32
  }
  func.func @transform_1(%arg0: i32, %arg1: i32) -> (i32, i32, i32) {
    %c0_i32 = arith.constant 0 : i32
    %c0_i32_0 = arith.constant 0 : i32
    %c0_i32_1 = arith.constant 0 : i32
    return %arg1, %c0_i32, %c0_i32_0 : i32, i32, i32
  }
  func.func @transform_2(%arg0: i32, %arg1: i32) -> (i32, i32, i32) {
    %c0_i32 = arith.constant 0 : i32
    %c0_i32_0 = arith.constant 0 : i32
    %c0_i32_1 = arith.constant 0 : i32
    return %arg1, %c0_i32, %c0_i32_0 : i32, i32, i32
  }
  func.func @transform_3(%arg0: i32, %arg1: i32) -> (i32, i32) {
    %c0_i32 = arith.constant 0 : i32
    %c0_i32_0 = arith.constant 0 : i32
    %c0_i32_1 = arith.constant 0 : i32
    return %c0_i32, %c0_i32_0 : i32, i32
  }
  func.func @transform_4(%arg0: i32, %arg1: i32) -> (i32, i32, i32) {
    %c0_i32 = arith.constant 0 : i32
    %c0_i32_0 = arith.constant 0 : i32
    %c0_i32_1 = arith.constant 0 : i32
    return %arg0, %c0_i32, %c0_i32_0 : i32, i32, i32
  }
}

</mosaic_0001>

<bundles_post_ra>
// kernel: tpu_custom_call.1
= control target key start
LH: loop header
LB: loop body
LE: loop exit
PB: predicated region body
PF: predicated region fallthrough
CT: control target
= control target key end

     0   :  { %9 = vsyncpa [#allocation4], 0  ;;  %s3410_s0 = inlined_call_operand.vmem [shape: f32[2,4,256], index: 0, kind: input, shape index: {}]   ;;  %s3411_s1 = inlined_call_operand.vmem [shape: f32[4,96,4], index: 1, kind: input, shape index: {}]   ;;  %s3412_s2 = inlined_call_operand.vmem [shape: f32[4,4,32], index: 2, kind: input, shape index: {}]   ;;  %s3413_s3 = inlined_call_operand.vmem [shape: f32[4,1], index: 3, kind: input, shape index: {}]   ;;  %s3414_s4 = inlined_call_operand.hbm [shape: f32[2,4,256], index: 4, kind: output, shape index: {}]  }
   0x1   :  { %11 = vsyncpa [#allocation4 + $0x1], 0  ;;  %s2604_s15 = smov 0   ;;  %s2606_s16 = smov 0  }
   0x2   :  { %s2608_s17 = smov 0   ;;  %s2610_s18 = smov 0  }
   0x3   :  { %s2612_s19 = smov 0   ;;  %s2614_s20 = smov 0  }
   0x4   :  { %s2616_s21 = smov 0   ;;  %s2618_s22 = smov 0  }
   0x5 LB: > { %3431 = sst [smem:[#allocation6_spill]] %s2568_s21  ;;  %s1978_s23 = sadd.s32 4294967295, %s2572_s22   ;;  %s2572_s22 = sphi %s2618_s22, %s17_s22   ;;  %s2568_s21 = sphi %s2616_s21, %s3467_s21   ;;  %s2564_s20 = sphi %s2614_s20, %s3472_s20   ;;  %s2560_s19 = sphi %s2612_s19, %s3465_s19   ;;  %s2556_s18 = sphi %s2610_s18, %s3471_s18   ;;  %s2552_s17 = sphi %s2608_s17, %s3470_s17   ;;  %s2548_s16 = sphi %s2606_s16, %s3469_s16   ;;  %s2544_s15 = sphi %s2604_s15, %s3468_s15  }
   0x6   : > { %s1979_s24 = sadd.s32 4294967294, %s2572_s22   ;;  %s26_s25 = sadd.s32 1, %s2564_s20 }
   0x7   : > { %p27_p0 = scmp.ge.s32.totalorder %s26_s25, 4  ;;  %s29_s26 = sadd.s32 1, %s2568_s21 }
   0x8   : > { %p145_p1 = scmp.ne.s32.totalorder %s2552_s17, %s2548_s16  ;;  %p146_p2 = scmp.eq.s32.totalorder %s1978_s23, 7 }
   0x9   : > { %s3474_s25 = smov (%p27_p0, %s26_s25), 0  ;;  %s3476_s26 = smov (!%p27_p0, %s29_s26), %s2568_s21 }
   0xa   : > { %3432 = sst [smem:[#allocation7_spill]] %s3474_s25  ;;  %p2653_p3 = por %p146_p2, %p145_p1 }
   0xb   : > { %p151_p4 = scmp.ne.s32.totalorder %s2548_s16, %s2544_s15  ;;  %p31_p5 = scmp.ge.s32.totalorder %s3476_s26, 2 }
   0xc   : > { %p152_p6 = scmp.eq.s32.totalorder %s1979_s24, 7  ;;  %p1982_p7 = scmp.ge.s32.totalorder %s2572_s22, 1 }
   0xd   : > { %p196_p8 = scmp.lt.s32.totalorder %s2572_s22, 9  ;;  %s3478_s26 = smov (%p31_p5, %s3476_s26), 0 }
   0xe   : > { %3434 = sst [smem:[#allocation8_spill]] %s3478_s26  ;;  %p2663_p9 = por %p152_p6, %p151_p4 }
   0xf   : > { %p197_p10 = pnand %p1982_p7, %p196_p8  ;;  %s132_s29 = ssub.s32 %s2568_s21, %s3478_s26 }
  0x10   : > { %s135_s30 = sadd.s32 1, %s2552_s17  ;;  %p133_p11 = scmp.eq.s32.totalorder %s132_s29, 0 }
  0x11   : > { %200 = sbr.rel (%p197_p10) target bundleno = 1540 (0x604), region = 36 }
  0x12   : > { %s2671_s5 = scalar_select %p133_p11, %s2552_s17, %s135_s30  }
  0x18   : > { %s3416_s6 = sand.u32 1, %s2548_s16   ;;  %p231_p12 = scmp.lt.s32.totalorder %s2560_s19, 1 }
  0x19   : > { %s2677_s7 = sshll.u32 %s3416_s6, 3  ;;  %p236_p13 = scmp.lt.s32.totalorder %s2556_s18, 3 }
  0x1a   : > { %s232_s8 = scalar_select %p231_p12, %s2560_s19, 1 }
  0x1b   : > { %s237_s9 = scalar_select %p236_p13, %s2556_s18, 3 }
  0x1c   : > { %s2074_s10 = sshll.u32 %s232_s8, 3  ;;  %s230_s21 = scalar_lea.vmem [#allocation3], %s2677_s7 }
  0x1d   : > { %s235_s13 = scalar_lea.vmem %s3410_s0, %s2074_s10  ;;  %s2176_s14 = smul.u32 96, %s237_s9 }
  0x1e   : > { %s1987_s23 = sshll.u32 %s237_s9, 2  ;;  %p1988_p0 = scmp.ne.s32.totalorder %s2556_s18, 0 }
  0x1f   : > { %s2688_s30 = scalar_lea.vmem %s3411_s1, %s2176_s14  ;;  %s2693_s6 = scalar_lea.vmem %s3412_s2, %s1987_s23  ;;  %v2574_v0 = vmov (!%p1988_p0), 0.0  }
  0x20   : > { %248 = sbr.rel (%p1988_p0) target bundleno = 39 (0x27), region = 40  ;;  %249 = vst [vmem:[#allocation2] sm:$0xff] (!%p1988_p0), %v2574_v0 }
  0x27 PF: > { %v250_v1 = vld [vmem:[%s235_s13] sm:$0xff]  ;;  %vm302_vm0 = vcmask 1043456   ;;  %v2575_v3 = vmov 0.0   ;;  %vm265_vm1 = vcmask 31744   ;;  %v258_v5 = vld [vmem:[%s2688_s30 + $0x38] sm:$0xff]  ;;  %v252_v6 = vld [vmem:[%s2688_s30 + $0x8] sm:$0xff] }
  0x28   : > { %v264_v2 = vcombine.high %v250_v1, %v250_v1  ;;  %371 = vmatprep.mubr.f32.mxu0 %v2575_v3  ;;  %413 = vmatprep.mubr.f32.mxu1 %v2575_v3  ;;  %v251_v4 = vld [vmem:[%s2688_s30] sm:$0xff]  ;;  %v253_v7 = vld [vmem:[%s2688_s30 + $0x10] sm:$0xff]  ;;  %v254_v8 = vld [vmem:[%s2688_s30 + $0x18] sm:$0xff]  ;;  %p2068_p1 = scmp.ne.s32.totalorder %s2556_s18, 3 }
  0x29   : > { %v255_v9 = vld [vmem:[%s2688_s30 + $0x20] sm:$0xff]  ;;  %v256_v10 = vld [vmem:[%s2688_s30 + $0x28] sm:$0xff]  ;;  %v257_v11 = vld [vmem:[%s2688_s30 + $0x30] sm:$0xff] }
  0x2a   : > { %1989 = vmatprep.subr.msk.mxu0 %vm302_vm0, %v264_v2  ;;  %2174 = vmatprep.subr.msk.mxu1 %vm302_vm0, %v264_v2  ;;  %v259_v52 = vld [vmem:[%s2688_s30 + $0x40] sm:$0xff]  ;;  %v260_v53 = vld [vmem:[%s2688_s30 + $0x48] sm:$0xff]  ;;  %v261_v54 = vld [vmem:[%s2688_s30 + $0x50] sm:$0xff] }
  0x2b   : > { %1990 = vmatpush1.msk.msra.mxu0 %vm302_vm0, %v250_v1  ;;  %2175 = vmatpush1.msk.msra.mxu1 %vm302_vm0, %v250_v1  ;;  %v262_v55 = vld [vmem:[%s2688_s30 + $0x58] sm:$0xff] }
  0x2c   : > { %1991 = vmatmul.mubr.msk.f32.vlgmr.msra.gmra.mrb[0].mxu0 %vm265_vm1, %v251_v4  ;;  %1998 = vmatmul.mubr.msk.f32.vlgmr.msra.gmra.mrb[0].mxu1 %vm265_vm1, %v258_v5 }
  0x2d   : > { %377 = vmatprep.mubr.f32.mxu0 %v2575_v3  ;;  %419 = vmatprep.mubr.f32.mxu1 %v2575_v3 }
  0x30   : > { %1992 = vmatmul.mubr.msk.f32.gmra.mrb[2].mxu0 %vm265_vm1, %v252_v6  ;;  %1999 = vmatmul.mubr.msk.f32.gmra.mrb[2].mxu1 %vm265_vm1, %v259_v52 }
  0x31   : > { %383 = vmatprep.mubr.f32.mxu0 %v2575_v3  ;;  %425 = vmatprep.mubr.f32.mxu1 %v2575_v3 }
  0x34   : > { %1993 = vmatmul.mubr.msk.f32.gmra.mrb[4].mxu0 %vm265_vm1, %v253_v7  ;;  %2000 = vmatmul.mubr.msk.f32.gmra.mrb[4].mxu1 %vm265_vm1, %v260_v53 }
  0x35   : > { %389 = vmatprep.mubr.f32.mxu0 %v2575_v3  ;;  %431 = vmatprep.mubr.f32.mxu1 %v2575_v3 }
  0x38   : > { %1994 = vmatmul.mubr.msk.f32.gmra.mrb[6].mxu0 %vm265_vm1, %v254_v8  ;;  %2001 = vmatmul.mubr.msk.f32.gmra.mrb[6].mxu1 %vm265_vm1, %v261_v54 }
  0x39   : > { %395 = vmatprep.mubr.f32.mxu0 %v2575_v3  ;;  %437 = vmatprep.mubr.f32.mxu1 %v2575_v3 }
  0x3c   : > { %1995 = vmatmul.mubr.msk.f32.gmra.mrb[8].mxu0 %vm265_vm1, %v255_v9  ;;  %2002 = vmatmul.mubr.msk.f32.gmra.mrb[8].mxu1 %vm265_vm1, %v262_v55 }
  0x3d   : > { %401 = vmatprep.mubr.f32.mxu0 %v2575_v3  ;;  %805 = vmatprep.mubr.f32.mxu1 %v2575_v3 }
  0x40   : > { %1996 = vmatmul.mubr.msk.f32.gmra.mrb[10].mxu0 %vm265_vm1, %v256_v10 }
  0x41   : > { %407 = vmatprep.mubr.f32.mxu0 %v2575_v3 }
  0x44   : > { %1997 = vmatmul.mubr.msk.f32.gmra.mrb[12].mxu0 %vm265_vm1, %v257_v11 }
  0xff   : > { %v2722_v12 = vpop.f32.mrb[0].mxu0  ;;  %v2724_v13 = vpop.f32.mrb[0].mxu1 }
 0x100   : > { %v444_v14 = vmul.f32 %v2722_v12, %v2722_v12  ;;  %v2728_v15 = vpop.f32.mrb[1].mxu0  ;;  %v502_v16 = vmul.f32 %v2724_v13, %v2724_v13  ;;  %v2732_v17 = vpop.f32.mrb[1].mxu1 }
 0x101   : > { %v445_v18 = vmul.f32 %v2728_v15, %v2728_v15  ;;  %v503_v19 = vmul.f32 %v2732_v17, %v2732_v17 }
 0x103   : > { %v2738_v20 = vpop.f32.mrb[2].mxu0  ;;  %v452_v21 = vadd.f32 %v445_v18, %v444_v14  ;;  %v513_v22 = vadd.f32 %v503_v19, %v502_v16 }
 0x104   : > { %v446_v23 = vmul.f32 %v2738_v20, %v2738_v20  ;;  %v2742_v24 = vpop.f32.mrb[3].mxu0 }
 0x105   : > { %v447_v25 = vmul.f32 %v2742_v24, %v2742_v24  ;;  %453 = vadd.xlane.f32.xlu0 %v452_v21 }
 0x107   : > { %v2746_v26 = vpop.f32.mrb[4].mxu0  ;;  %v455_v27 = vadd.f32 %v447_v25, %v446_v23 }
 0x108   : > { %v448_v28 = vmul.f32 %v2746_v26, %v2746_v26  ;;  %v2750_v29 = vpop.f32.mrb[5].mxu0 }
 0x109   : > { %v449_v30 = vmul.f32 %v2750_v29, %v2750_v29  ;;  %456 = vadd.xlane.f32.xlu0 %v455_v27 }
 0x10b   : > { %v2754_v31 = vpop.f32.mrb[6].mxu0  ;;  %v458_v32 = vadd.f32 %v449_v30, %v448_v28 }
 0x10c   : > { %v450_v33 = vmul.f32 %v2754_v31, %v2754_v31  ;;  %v2758_v34 = vpop.f32.mrb[7].mxu0 }
 0x10d   : > { %v451_v35 = vmul.f32 %v2758_v34, %v2758_v34  ;;  %459 = vadd.xlane.f32.xlu1 %v458_v32 }
 0x10f   : > { %v2762_v36 = vpop.f32.mrb[8].mxu0  ;;  %v461_v37 = vadd.f32 %v451_v35, %v450_v33 }
 0x110   : > { %v496_v38 = vmul.f32 %v2762_v36, %v2762_v36  ;;  %v2766_v39 = vpop.f32.mrb[9].mxu0 }
 0x111   : > { %v497_v40 = vmul.f32 %v2766_v39, %v2766_v39  ;;  %462 = vadd.xlane.f32.xlu1 %v461_v37 }
 0x113   : > { %v2770_v41 = vpop.f32.mrb[10].mxu0  ;;  %v504_v42 = vadd.f32 %v497_v40, %v496_v38 }
 0x114   : > { %v498_v43 = vmul.f32 %v2770_v41, %v2770_v41  ;;  %v2774_v44 = vpop.f32.mrb[11].mxu0 }
 0x115   : > { %v499_v45 = vmul.f32 %v2774_v44, %v2774_v44  ;;  %505 = vadd.xlane.f32.xlu0 %v504_v42 }
 0x117   : > { %v2778_v46 = vpop.f32.mrb[12].mxu0  ;;  %v507_v47 = vadd.f32 %v499_v45, %v498_v43 }
 0x118   : > { %v500_v48 = vmul.f32 %v2778_v46, %v2778_v46  ;;  %v2782_v49 = vpop.f32.mrb[13].mxu0 }
 0x119   : > { %v501_v50 = vmul.f32 %v2782_v49, %v2782_v49  ;;  %508 = vadd.xlane.f32.xlu1 %v507_v47 }
 0x11b   : > { %v510_v51 = vadd.f32 %v501_v50, %v500_v48 }
 0x11d   : > { %514 = vadd.xlane.f32.xlu1 %v513_v22  ;;  %511 = vadd.xlane.f32.xlu0 %v510_v51 }
 0x192   : > { %v454_v56 = vpop.xlane.xlu0 %453 }
 0x193   : > { %2253 = vrsqrt.f32 %v454_v56  ;;  %vm466_vm2 = vcmp.eq.f32.partialorder %v454_v56, inf  ;;  %v469_v62 = vand.u32 2147483648, %v454_v56  ;;  %vm468_vm3 = vcmp.eq.f32.partialorder %v454_v56, 0.0 }
 0x196   : > { %v457_v57 = vpop.xlane.xlu0 %456 }
 0x197   : > { %2255 = vrsqrt.f32 %v457_v57  ;;  %vm473_vm4 = vcmp.eq.f32.partialorder %v457_v57, inf  ;;  %v476_v6 = vand.u32 2147483648, %v457_v57  ;;  %vm475_vm5 = vcmp.eq.f32.partialorder %v457_v57, 0.0 }
 0x19a   : > { %v460_v58 = vpop.xlane.xlu1 %459 }
 0x19b   : > { %2257 = vrsqrt.f32 %v460_v58  ;;  %vm480_vm6 = vcmp.eq.f32.partialorder %v460_v58, inf  ;;  %v483_v16 = vand.u32 2147483648, %v460_v58  ;;  %vm482_vm7 = vcmp.eq.f32.partialorder %v460_v58, 0.0 }
 0x19d   : > { %v2254_v59 = vpop.eup %2253 }
 0x19e   : > { %v463_v60 = vpop.xlane.xlu1 %462  ;;  %v465_v61 = vmul.f32 %v2254_v59, %v454_v56 }
 0x19f   : > { %2259 = vrsqrt.f32 %v463_v60  ;;  %vm487_vm8 = vcmp.eq.f32.partialorder %v463_v60, inf  ;;  %vm489_vm9 = vcmp.eq.f32.partialorder %v463_v60, 0.0  ;;  %v490_v28 = vand.u32 2147483648, %v463_v60 }
 0x1a0   : > { %v467_v63 = vsel %vm466_vm2, %v454_v56, %v465_v61  ;;  %vm644_vm2 = vcmask 261120  }
 0x1a1   : > { %v2256_v0 = vpop.eup %2255  ;;  %v470_v1 = vsel %vm468_vm3, %v469_v62, %v467_v63  ;;  %vm3269_vm3 = vmpackc.low %vm644_vm2, %vm644_vm2 }
 0x1a2   : > { %v472_v2 = vmul.f32 %v2256_v0, %v457_v57  ;;  %v506_v4 = vpop.xlane.xlu0 %505  ;;  %v492_v5 = vmax.f32 %v470_v1, 1e-12 }
 0x1a3   : > { %2261 = vrsqrt.f32 %v506_v4  ;;  %vm518_vm10 = vcmp.eq.f32.partialorder %v506_v4, inf  ;;  %v521_v32 = vand.u32 2147483648, %v506_v4  ;;  %vm520_vm11 = vcmp.eq.f32.partialorder %v506_v4, 0.0 }
 0x1a4   : > { %2263 = vrcp.f32 %v492_v5  ;;  %v474_v7 = vsel %vm473_vm4, %v457_v57, %v472_v2 }
 0x1a5   : > { %v2258_v8 = vpop.eup %2257  ;;  %v477_v9 = vsel %vm475_vm5, %v476_v6, %v474_v7 }
 0x1a6   : > { %v479_v10 = vmul.f32 %v2258_v8, %v460_v58  ;;  %v509_v11 = vpop.xlane.xlu1 %508  ;;  %v493_v14 = vmax.f32 %v477_v9, 1e-12 }
 0x1a7   : > { %2265 = vrsqrt.f32 %v509_v11  ;;  %vm525_vm12 = vcmp.eq.f32.partialorder %v509_v11, inf  ;;  %v528_v45 = vand.u32 2147483648, %v509_v11  ;;  %vm527_vm13 = vcmp.eq.f32.partialorder %v509_v11, 0.0 }
 0x1a8   : > { %2267 = vrcp.f32 %v493_v14  ;;  %v481_v18 = vsel %vm480_vm6, %v460_v58, %v479_v10 }
 0x1a9   : > { %v2260_v19 = vpop.eup %2259  ;;  %v484_v21 = vsel %vm482_vm7, %v483_v16, %v481_v18 }
 0x1aa   : > { %v486_v22 = vmul.f32 %v2260_v19, %v463_v60  ;;  %v515_v23 = vpop.xlane.xlu1 %514  ;;  %v512_v25 = vpop.xlane.xlu0 %511  ;;  %v494_v27 = vmax.f32 %v484_v21, 1e-12 }
 0x1ab   : > { %2269 = vrsqrt.f32 %v515_v23  ;;  %vm539_vm14 = vcmp.eq.f32.partialorder %v515_v23, inf  ;;  %vm541_vm15 = vcmp.eq.f32.partialorder %v515_v23, 0.0  ;;  %v542_v57 = vand.u32 2147483648, %v515_v23 }
 0x1ac   : > { %2271 = vrsqrt.f32 %v512_v25  ;;  %v488_v33 = vsel %vm487_vm8, %v463_v60, %v486_v22  ;;  %vm532_vm0 = vcmp.eq.f32.partialorder %v512_v25, inf  ;;  %v535_v62 = vand.u32 2147483648, %v512_v25 }
 0x1ad   : > { %v2262_v30 = vpop.eup %2261  ;;  %2273 = vrcp.f32 %v494_v27  ;;  %v491_v38 = vsel %vm489_vm9, %v490_v28, %v488_v33  ;;  %vm534_vm1 = vcmp.eq.f32.partialorder %v512_v25, 0.0 }
 0x1ae   : > { %v2264_v35 = vpop.eup %2263  ;;  %v517_v37 = vmul.f32 %v2262_v30, %v506_v4  ;;  %v495_v42 = vmax.f32 %v491_v38, 1e-12 }
 0x1af   : > { %v549_v40 = vmul.f32 10.0, %v2264_v35 }
 0x1b0   : > { %v519_v43 = vsel %vm518_vm10, %v506_v4, %v517_v37  ;;  %2275 = vrcp.f32 %v495_v42 }
 0x1b1   : > { %v2266_v47 = vpop.eup %2265  ;;  %v557_v48 = vmul.f32 %v549_v40, %v2728_v15  ;;  %v556_v50 = vmul.f32 %v549_v40, %v2722_v12  ;;  %v522_v51 = vsel %vm520_vm11, %v521_v32, %v519_v43 }
 0x1b2   : > { %v2268_v52 = vpop.eup %2267  ;;  %v524_v53 = vmul.f32 %v2266_v47, %v509_v11  ;;  %v544_v54 = vmax.f32 %v522_v51, 1e-12 }
 0x1b3   : > { %612 = vxpose.xlu1.b32.start [1/4] (short) %v557_v48, 128  ;;  %580 = vxpose.xlu0.b32.start [1/4] (short) %v556_v50, 128  ;;  %v551_v55 = vmul.f32 10.0, %v2268_v52 }
 0x1b4   : > { %v526_v56 = vsel %vm525_vm12, %v509_v11, %v524_v53  ;;  %2277 = vrcp.f32 %v544_v54 }
 0x1b5   : > { %v2270_v58 = vpop.eup %2269  ;;  %v559_v59 = vmul.f32 %v551_v55, %v2742_v24  ;;  %v558_v15 = vmul.f32 %v551_v55, %v2738_v20  ;;  %v529_v12 = vsel %vm527_vm13, %v528_v45, %v526_v56 }
 0x1b6   : > { %v2272_v60 = vpop.eup %2271  ;;  %v538_v61 = vmul.f32 %v2270_v58, %v515_v23  ;;  %v545_v63 = vmax.f32 %v529_v12, 1e-12 }
 0x1b7   : > { %v2274_v0 = vpop.eup %2273  ;;  %v531_v1 = vmul.f32 %v2272_v60, %v512_v25  ;;  %613 = vxpose.xlu1.b32.cont [2/4] (short) %v559_v59, 128  ;;  %581 = vxpose.xlu0.b32.cont [2/4] (short) %v558_v15, 128 }
 0x1b8   : > { %v540_v2 = vsel %vm539_vm14, %v515_v23, %v538_v61  ;;  %v553_v4 = vmul.f32 10.0, %v2274_v0  ;;  %2279 = vrcp.f32 %v545_v63 }
 0x1b9   : > { %v543_v5 = vsel %vm541_vm15, %v542_v57, %v540_v2  ;;  %v533_v24 = vsel %vm532_vm0, %v512_v25, %v531_v1 }
 0x1ba   : > { %v547_v20 = vmax.f32 %v543_v5, 1e-12  ;;  %v536_v6 = vsel %vm534_vm1, %v535_v62, %v533_v24  ;;  %v561_v7 = vmul.f32 %v553_v4, %v2750_v29  ;;  %v560_v8 = vmul.f32 %v553_v4, %v2746_v26  ;;  %v2276_v9 = vpop.eup %2275 }
 0x1bb   : > { %v546_v10 = vmax.f32 %v536_v6, 1e-12  ;;  %v555_v11 = vmul.f32 10.0, %v2276_v9 }
 0x1bc   : > { %2281 = vrcp.f32 %v547_v20  ;;  %614 = vxpose.xlu1.b32.cont [3/4] (short) %v561_v7, 128  ;;  %582 = vxpose.xlu0.b32.cont [3/4] (short) %v560_v8, 128 }
 0x1bd   : > { %2283 = vrcp.f32 %v546_v10  ;;  %v563_v14 = vmul.f32 %v555_v11, %v2758_v34  ;;  %v562_v16 = vmul.f32 %v555_v11, %v2754_v31 }
 0x1be   : > { %v2278_v18 = vpop.eup %2277 }
 0x1bf   : > { %v573_v21 = vmul.f32 %v2278_v18, %v2766_v39  ;;  %v572_v26 = vmul.f32 %v2278_v18, %v2762_v36  ;;  %v421_v36 = vpop.f32.mrb[2].mxu1 }
 0x1c0   : > { %615 = vxpose.xlu1.b32.end [4/4] (short) %v563_v14, 128  ;;  %583 = vxpose.xlu0.b32.end [4/4] (short) %v562_v16, 128 }
 0x1c2   : > { %v2280_v19 = vpop.eup %2279 }
 0x1c3   : > { %v575_v29 = vmul.f32 %v2280_v19, %v2774_v44  ;;  %v574_v22 = vmul.f32 %v2280_v19, %v2770_v41  ;;  %v423_v41 = vpop.f32.mrb[3].mxu1 }
 0x1c4   : > { %v427_v33 = vpop.f32.mrb[4].mxu1 }
 0x1c5   : > { %v2110_v23 = vpack.c.bf16 %v575_v29, %v573_v21  ;;  %v2112_v25 = vpack.c.bf16 %v574_v22, %v572_v26  ;;  %v2120_v37 = vpack.c.bf16 %v427_v33, %v421_v36 }
 0x1c6   : > { %v2282_v27 = vpop.eup %2281 }
 0x1c7   : > { %v2284_v28 = vpop.eup %2283  ;;  %2111 = vmatprep.subr.bf16.mxu1 %v2110_v23  ;;  %v579_v34 = vmul.f32 %v2282_v27, %v2732_v17  ;;  %v578_v31 = vmul.f32 %v2282_v27, %v2724_v13  ;;  %v429_v17 = vpop.f32.mrb[5].mxu1 }
 0x1c8   : > { %2113 = vmatpush1.bf16.msra.mxu1 %v2112_v25  ;;  %v577_v30 = vmul.f32 %v2284_v28, %v2782_v49  ;;  %v576_v39 = vmul.f32 %v2284_v28, %v2778_v46  ;;  %v2118_v13 = vpack.c.bf16 %v429_v17, %v423_v41  ;;  %v433_v38 = vpop.f32.mrb[6].mxu1 }
 0x1c9   : > { %v435_v49 = vpop.f32.mrb[7].mxu1 }
 0x1ca   : > { %v2114_v32 = vpack.c.bf16 %v579_v34, %v577_v30  ;;  %v2116_v44 = vpack.c.bf16 %v578_v31, %v576_v39  ;;  %2119 = vmatprep.subr.bf16.mxu0 %v2118_v13  ;;  %v439_v46 = vpop.f32.mrb[8].mxu1 }
 0x1cb   : > { %2121 = vmatpush1.bf16.xpose.msra.mxu0 %v2120_v37  ;;  %v2124_v42 = vpack.c.bf16 %v439_v46, %v433_v38  ;;  %v441_v43 = vpop.f32.mrb[9].mxu1 }
 0x1cc   : > { %2115 = vmatprep.subr.bf16.mxu1 %v2114_v32  ;;  %v2122_v45 = vpack.c.bf16 %v441_v43, %v435_v49 }
 0x1cd   : > { %2117 = vmatpush1.bf16.msra.mxu1 %v2116_v44 }
 0x1ce   : > { %2123 = vmatprep.subr.bf16.mxu0 %v2122_v45 }
 0x1d3   : > { %2125 = vmatpush1.bf16.xpose.msra.mxu0 %v2124_v42 }
 0x234   : > { %v596_v35 = vpop.trf.xlu0  ;;  %v628_v55 = vpop.trf.xlu1 }
 0x235   : > { %2003 = vmatmul.mubr.msk.f32.vlgmr.msra.gmra.mrb[10].mxu1 %vm644_vm2, %v596_v35 }
 0x236   : > { %811 = vmatprep.mubr.f32.mxu1 %v2575_v3 }
 0x238   : > { %v597_v40 = vpop.trf.xlu0  ;;  %v629_v57 = vpop.trf.xlu1 }
 0x239   : > { %2004 = vmatmul.mubr.msk.f32.gmra.mrb[12].mxu1 %vm644_vm2, %v597_v40 }
 0x23a   : > { %817 = vmatprep.mubr.f32.mxu1 %v2575_v3 }
 0x23c   : > { %v598_v47 = vpop.trf.xlu0  ;;  %v630_v15 = vpop.trf.xlu1 }
 0x23d   : > { %2005 = vmatmul.mubr.msk.f32.gmra.mrb[14].mxu1 %vm644_vm2, %v598_v47 }
 0x23e   : > { %823 = vmatprep.mubr.f32.mxu1 %v2575_v3 }
 0x240   : > { %v599_v48 = vpop.trf.xlu0  ;;  %v631_v60 = vpop.trf.xlu1 }
 0x241   : > { %2006 = vmatmul.mubr.msk.f32.gmra.mrb[16].mxu1 %vm644_vm2, %v599_v48 }
 0x242   : > { %829 = vmatprep.mubr.f32.mxu1 %v2575_v3 }
 0x244   : > { %v600_v50 = vpop.trf.xlu0  ;;  %v632_v63 = vpop.trf.xlu1 }
 0x245   : > { %2007 = vmatmul.mubr.msk.f32.gmra.mrb[18].mxu1 %vm644_vm2, %v600_v50 }
 0x246   : > { %835 = vmatprep.mubr.f32.mxu1 %v2575_v3 }
 0x248   : > { %v601_v51 = vpop.trf.xlu0  ;;  %v633_v1 = vpop.trf.xlu1 }
 0x249   : > { %2008 = vmatmul.mubr.msk.f32.gmra.mrb[20].mxu1 %vm644_vm2, %v601_v51 }
 0x24a   : > { %841 = vmatprep.mubr.f32.mxu1 %v2575_v3 }
 0x24c   : > { %v602_v52 = vpop.trf.xlu0  ;;  %v634_v2 = vpop.trf.xlu1 }
 0x24d   : > { %2009 = vmatmul.mubr.msk.f32.gmra.mrb[22].mxu1 %vm644_vm2, %v602_v52 }
 0x24e   : > { %847 = vmatprep.mubr.f32.mxu1 %v2575_v3 }
 0x250   : > { %v603_v53 = vpop.trf.xlu0  ;;  %v635_v4 = vpop.trf.xlu1 }
 0x251   : > { %2010 = vmatmul.mubr.msk.f32.gmra.mrb[24].mxu1 %vm644_vm2, %v603_v53 }
 0x252   : > { %853 = vmatprep.mubr.f32.mxu1 %v2575_v3 }
 0x254   : > { %v604_v54 = vpop.trf.xlu0  ;;  %v636_v5 = vpop.trf.xlu1 }
 0x255   : > { %2011 = vmatmul.mubr.msk.f32.gmra.mrb[26].mxu1 %vm644_vm2, %v604_v54 }
 0x256   : > { %859 = vmatprep.mubr.f32.mxu1 %v2575_v3 }
 0x258   : > { %v605_v56 = vpop.trf.xlu0  ;;  %v637_v24 = vpop.trf.xlu1 }
 0x259   : > { %2012 = vmatmul.mubr.msk.f32.gmra.mrb[28].mxu1 %vm644_vm2, %v605_v56 }
 0x25a   : > { %865 = vmatprep.mubr.f32.mxu1 %v2575_v3 }
 0x25c   : > { %v606_v58 = vpop.trf.xlu0  ;;  %v638_v20 = vpop.trf.xlu1 }
 0x25d   : > { %2013 = vmatmul.mubr.msk.f32.gmra.mrb[30].mxu1 %vm644_vm2, %v606_v58 }
 0x25e   : > { %871 = vmatprep.mubr.f32.mxu1 %v2575_v3 }
 0x260   : > { %v607_v59 = vpop.trf.xlu0  ;;  %v639_v6 = vpop.trf.xlu1 }
 0x261   : > { %2014 = vmatmul.mubr.msk.f32.gmra.mrb[32].mxu1 %vm644_vm2, %v607_v59 }
 0x262   : > { %877 = vmatprep.mubr.f32.mxu1 %v2575_v3 }
 0x264   : > { %v608_v12 = vpop.trf.xlu0  ;;  %v640_v7 = vpop.trf.xlu1 }
 0x265   : > { %2015 = vmatmul.mubr.msk.f32.gmra.mrb[34].mxu1 %vm644_vm2, %v608_v12 }
 0x266   : > { %883 = vmatprep.mubr.f32.mxu1 %v2575_v3 }
 0x268   : > { %v609_v61 = vpop.trf.xlu0  ;;  %v641_v8 = vpop.trf.xlu1 }
 0x269   : > { %2016 = vmatmul.mubr.msk.f32.gmra.mrb[36].mxu1 %vm644_vm2, %v609_v61 }
 0x26a   : > { %889 = vmatprep.mubr.f32.mxu1 %v2575_v3 }
 0x26c   : > { %v610_v62 = vpop.trf.xlu0  ;;  %v642_v9 = vpop.trf.xlu1 }
 0x26d   : > { %2017 = vmatmul.mubr.msk.f32.gmra.mrb[38].mxu1 %vm644_vm2, %v610_v62 }
 0x26e   : > { %895 = vmatprep.mubr.f32.mxu1 %v2575_v3 }
 0x270   : > { %v611_v0 = vpop.trf.xlu0  ;;  %v643_v10 = vpop.trf.xlu1 }
 0x271   : > { %2018 = vmatmul.mubr.msk.f32.gmra.mrb[40].mxu1 %vm644_vm2, %v611_v0 }
 0x272   : > { %901 = vmatprep.mubr.f32.mxu1 %v2575_v3 }
 0x275   : > { %2019 = vmatmul.mubr.msk.f32.gmra.mrb[42].mxu1 %vm644_vm2, %v628_v55 }
 0x276   : > { %907 = vmatprep.mubr.f32.mxu1 %v2575_v3 }
 0x279   : > { %2020 = vmatmul.mubr.msk.f32.gmra.mrb[44].mxu1 %vm644_vm2, %v629_v57 }
 0x27a   : > { %913 = vmatprep.mubr.f32.mxu1 %v2575_v3 }
 0x27d   : > { %2021 = vmatmul.mubr.msk.f32.gmra.mrb[46].mxu1 %vm644_vm2, %v630_v15 }
 0x27e   : > { %919 = vmatprep.mubr.f32.mxu1 %v2575_v3 }
 0x281   : > { %2022 = vmatmul.mubr.msk.f32.gmra.mrb[48].mxu1 %vm644_vm2, %v631_v60 }
 0x282   : > { %925 = vmatprep.mubr.f32.mxu1 %v2575_v3 }
 0x285   : > { %2023 = vmatmul.mubr.msk.f32.gmra.mrb[50].mxu1 %vm644_vm2, %v632_v63 }
 0x286   : > { %931 = vmatprep.mubr.f32.mxu1 %v2575_v3 }
 0x289   : > { %2024 = vmatmul.mubr.msk.f32.gmra.mrb[52].mxu1 %vm644_vm2, %v633_v1 }
 0x28a   : > { %937 = vmatprep.mubr.f32.mxu1 %v2575_v3 }
 0x28d   : > { %2025 = vmatmul.mubr.msk.f32.gmra.mrb[54].mxu1 %vm644_vm2, %v634_v2 }
 0x28e   : > { %943 = vmatprep.mubr.f32.mxu1 %v2575_v3 }
 0x291   : > { %2026 = vmatmul.mubr.msk.f32.gmra.mrb[56].mxu1 %vm644_vm2, %v635_v4 }
 0x292   : > { %949 = vmatprep.mubr.f32.mxu1 %v2575_v3 }
 0x295   : > { %2027 = vmatmul.mubr.msk.f32.gmra.mrb[58].mxu1 %vm644_vm2, %v636_v5 }
 0x296   : > { %955 = vmatprep.mubr.f32.mxu1 %v2575_v3 }
 0x299   : > { %2028 = vmatmul.mubr.msk.f32.gmra.mrb[60].mxu1 %vm644_vm2, %v637_v24 }
 0x29a   : > { %961 = vmatprep.mubr.f32.mxu1 %v2575_v3 }
 0x29d   : > { %2029 = vmatmul.mubr.msk.f32.gmra.mrb[62].mxu1 %vm644_vm2, %v638_v20 }
 0x29e   : > { %967 = vmatprep.mubr.f32.mxu1 %v2575_v3 }
 0x2a1   : > { %2030 = vmatmul.mubr.msk.f32.gmra.mrb[64].mxu1 %vm644_vm2, %v639_v6 }
 0x2a2   : > { %973 = vmatprep.mubr.f32.mxu1 %v2575_v3 }
 0x2a5   : > { %2031 = vmatmul.mubr.msk.f32.gmra.mrb[66].mxu1 %vm644_vm2, %v640_v7 }
 0x2a6   : > { %979 = vmatprep.mubr.f32.mxu1 %v2575_v3 }
 0x2a9   : > { %2032 = vmatmul.mubr.msk.f32.gmra.mrb[68].mxu1 %vm644_vm2, %v641_v8 }
 0x2aa   : > { %985 = vmatprep.mubr.f32.mxu1 %v2575_v3 }
 0x2ad   : > { %2033 = vmatmul.mubr.msk.f32.gmra.mrb[70].mxu1 %vm644_vm2, %v642_v9 }
 0x2ae   : > { %991 = vmatprep.mubr.f32.mxu1 %v2575_v3 }
 0x2b1   : > { %2034 = vmatmul.mubr.msk.f32.gmra.mrb[72].mxu1 %vm644_vm2, %v643_v10 }
 0x308   : > { %v2880_v11 = vpop.f32.mrb[10].mxu1 }
 0x309   : > { %v2882_v14 = vpop.f32.mrb[11].mxu1 }
 0x30a   : > { %v998_v16 = vmax.f32 %v2880_v11, %v2882_v14 }
 0x30c   : > { %999 = vmax.xlane.f32.xlu0 %v998_v16  ;;  %v2886_v18 = vpop.f32.mrb[12].mxu1 }
 0x30d   : > { %v2888_v19 = vpop.f32.mrb[13].mxu1 }
 0x30e   : > { %v1001_v21 = vmax.f32 %v2886_v18, %v2888_v19 }
 0x310   : > { %1002 = vmax.xlane.f32.xlu1 %v1001_v21  ;;  %v2892_v29 = vpop.f32.mrb[14].mxu1 }
 0x311   : > { %v2894_v3 = vpop.f32.mrb[15].mxu1 }
 0x312   : > { %v1004_v26 = vmax.f32 %v2892_v29, %v2894_v3 }
 0x314   : > { %1005 = vmax.xlane.f32.xlu0 %v1004_v26  ;;  %v2898_v22 = vpop.f32.mrb[16].mxu1 }
 0x315   : > { %v2900_v23 = vpop.f32.mrb[17].mxu1 }
 0x316   : > { %v1007_v25 = vmax.f32 %v2898_v22, %v2900_v23 }
 0x318   : > { %1008 = vmax.xlane.f32.xlu1 %v1007_v25  ;;  %v2904_v27 = vpop.f32.mrb[18].mxu1 }
 0x319   : > { %v2906_v28 = vpop.f32.mrb[19].mxu1 }
 0x31a   : > { %v1010_v34 = vmax.f32 %v2904_v27, %v2906_v28 }
 0x31c   : > { %1011 = vmax.xlane.f32.xlu0 %v1010_v34  ;;  %v2910_v31 = vpop.f32.mrb[20].mxu1 }
 0x31d   : > { %v2912_v30 = vpop.f32.mrb[21].mxu1 }
 0x31e   : > { %v1013_v39 = vmax.f32 %v2910_v31, %v2912_v30 }
 0x320   : > { %1014 = vmax.xlane.f32.xlu1 %v1013_v39  ;;  %v2916_v32 = vpop.f32.mrb[22].mxu1 }
 0x321   : > { %v2918_v44 = vpop.f32.mrb[23].mxu1 }
 0x322   : > { %v1016_v36 = vmax.f32 %v2916_v32, %v2918_v44 }
 0x324   : > { %1017 = vmax.xlane.f32.xlu0 %v1016_v36  ;;  %v2922_v41 = vpop.f32.mrb[24].mxu1 }
 0x325   : > { %v2924_v33 = vpop.f32.mrb[25].mxu1 }
 0x326   : > { %v1019_v35 = vmax.f32 %v2922_v41, %v2924_v33 }
 0x328   : > { %1020 = vmax.xlane.f32.xlu1 %v1019_v35  ;;  %v2928_v37 = vpop.f32.mrb[26].mxu1 }
 0x329   : > { %v2930_v17 = vpop.f32.mrb[27].mxu1 }
 0x32a   : > { %v1022_v13 = vmax.f32 %v2928_v37, %v2930_v17 }
 0x32c   : > { %1023 = vmax.xlane.f32.xlu0 %v1022_v13  ;;  %v2934_v38 = vpop.f32.mrb[28].mxu1 }
 0x32d   : > { %v2936_v49 = vpop.f32.mrb[29].mxu1 }
 0x32e   : > { %v1025_v40 = vmax.f32 %v2934_v38, %v2936_v49 }
 0x330   : > { %1026 = vmax.xlane.f32.xlu1 %v1025_v40  ;;  %v2940_v46 = vpop.f32.mrb[30].mxu1 }
 0x331   : > { %v2942_v42 = vpop.f32.mrb[31].mxu1 }
 0x332   : > { %v1028_v43 = vmax.f32 %v2940_v46, %v2942_v42 }
 0x334   : > { %1029 = vmax.xlane.f32.xlu0 %v1028_v43  ;;  %v2946_v45 = vpop.f32.mrb[32].mxu1 }
 0x335   : > { %v2948_v47 = vpop.f32.mrb[33].mxu1 }
 0x336   : > { %v1031_v48 = vmax.f32 %v2946_v45, %v2948_v47 }
 0x338   : > { %1032 = vmax.xlane.f32.xlu1 %v1031_v48  ;;  %v2952_v50 = vpop.f32.mrb[34].mxu1 }
 0x339   : > { %v2954_v51 = vpop.f32.mrb[35].mxu1 }
 0x33a   : > { %v1034_v52 = vmax.f32 %v2952_v50, %v2954_v51 }
 0x33c   : > { %1035 = vmax.xlane.f32.xlu0 %v1034_v52  ;;  %v2958_v53 = vpop.f32.mrb[36].mxu1 }
 0x33d   : > { %v2960_v54 = vpop.f32.mrb[37].mxu1 }
 0x33e   : > { %v1037_v55 = vmax.f32 %v2958_v53, %v2960_v54 }
 0x340   : > { %1038 = vmax.xlane.f32.xlu1 %v1037_v55  ;;  %v2964_v56 = vpop.f32.mrb[38].mxu1 }
 0x341   : > { %v2966_v57 = vpop.f32.mrb[39].mxu1 }
 0x342   : > { %v1040_v58 = vmax.f32 %v2964_v56, %v2966_v57 }
 0x344   : > { %1041 = vmax.xlane.f32.xlu0 %v1040_v58  ;;  %v2970_v59 = vpop.f32.mrb[40].mxu1 }
 0x345   : > { %v2972_v15 = vpop.f32.mrb[41].mxu1 }
 0x346   : > { %v1043_v12 = vmax.f32 %v2970_v59, %v2972_v15 }
 0x348   : > { %1044 = vmax.xlane.f32.xlu1 %v1043_v12  ;;  %v2976_v60 = vpop.f32.mrb[42].mxu1 }
 0x349   : > { %v2978_v61 = vpop.f32.mrb[43].mxu1 }
 0x34a   : > { %v1046_v62 = vmax.f32 %v2976_v60, %v2978_v61 }
 0x34c   : > { %1047 = vmax.xlane.f32.xlu0 %v1046_v62  ;;  %v2982_v63 = vpop.f32.mrb[44].mxu1 }
 0x34d   : > { %v2984_v0 = vpop.f32.mrb[45].mxu1 }
 0x34e   : > { %v1049_v1 = vmax.f32 %v2982_v63, %v2984_v0 }
 0x350   : > { %1050 = vmax.xlane.f32.xlu1 %v1049_v1  ;;  %v2988_v2 = vpop.f32.mrb[46].mxu1 }
 0x351   : > { %v2990_v4 = vpop.f32.mrb[47].mxu1 }
 0x352   : > { %v1052_v5 = vmax.f32 %v2988_v2, %v2990_v4 }
 0x354   : > { %1053 = vmax.xlane.f32.xlu0 %v1052_v5  ;;  %v2994_v24 = vpop.f32.mrb[48].mxu1 }
 0x355   : > { %v2996_v20 = vpop.f32.mrb[49].mxu1 }
 0x356   : > { %v1055_v6 = vmax.f32 %v2994_v24, %v2996_v20 }
 0x358   : > { %1056 = vmax.xlane.f32.xlu1 %v1055_v6  ;;  %v3000_v7 = vpop.f32.mrb[50].mxu1 }
 0x359   : > { %v3002_v8 = vpop.f32.mrb[51].mxu1 }
 0x35a   : > { %v1058_v9 = vmax.f32 %v3000_v7, %v3002_v8 }
 0x35c   : > { %1059 = vmax.xlane.f32.xlu0 %v1058_v9  ;;  %v3006_v10 = vpop.f32.mrb[52].mxu1 }
 0x35d   : > { %v3008_v16 = vpop.f32.mrb[53].mxu1 }
 0x35e   : > { %v1061_v21 = vmax.f32 %v3006_v10, %v3008_v16 }
 0x360   : > { %1062 = vmax.xlane.f32.xlu1 %v1061_v21  ;;  %v3012_v26 = vpop.f32.mrb[54].mxu1 }
 0x361   : > { %v3014_v25 = vpop.f32.mrb[55].mxu1 }
 0x362   : > { %v1064_v34 = vmax.f32 %v3012_v26, %v3014_v25 }
 0x364   : > { %1065 = vmax.xlane.f32.xlu0 %v1064_v34  ;;  %v3018_v39 = vpop.f32.mrb[56].mxu1 }
 0x365   : > { %v3020_v36 = vpop.f32.mrb[57].mxu1 }
 0x366   : > { %v1067_v35 = vmax.f32 %v3018_v39, %v3020_v36 }
 0x368   : > { %1068 = vmax.xlane.f32.xlu1 %v1067_v35  ;;  %v3024_v13 = vpop.f32.mrb[58].mxu1 }
 0x369   : > { %v3026_v40 = vpop.f32.mrb[59].mxu1 }
 0x36a   : > { %v1070_v43 = vmax.f32 %v3024_v13, %v3026_v40 }
 0x36c   : > { %1071 = vmax.xlane.f32.xlu0 %v1070_v43  ;;  %v3030_v48 = vpop.f32.mrb[60].mxu1 }
 0x36d   : > { %3436 = vst [vmem:[#allocation9_spill] sm:$0xff] %v3030_v48  ;;  %v3032_v52 = vpop.f32.mrb[61].mxu1 }
 0x36e   : > { %3437 = vst [vmem:[#allocation10_spill] sm:$0xff] %v3032_v52  ;;  %v1073_v55 = vmax.f32 %v3030_v48, %v3032_v52 }
 0x370   : > { %1074 = vmax.xlane.f32.xlu1 %v1073_v55  ;;  %v3036_v58 = vpop.f32.mrb[62].mxu1 }
 0x371   : > { %3438 = vst [vmem:[#allocation11_spill] sm:$0xff] %v3036_v58  ;;  %v3038_v12 = vpop.f32.mrb[63].mxu1 }
 0x372   : > { %3439 = vst [vmem:[#allocation12_spill] sm:$0xff] %v3038_v12  ;;  %v1076_v62 = vmax.f32 %v3036_v58, %v3038_v12 }
 0x374   : > { %1077 = vmax.xlane.f32.xlu0 %v1076_v62  ;;  %v3042_v1 = vpop.f32.mrb[64].mxu1 }
 0x375   : > { %3440 = vst [vmem:[#allocation13_spill] sm:$0xff] %v3042_v1  ;;  %v3044_v5 = vpop.f32.mrb[65].mxu1 }
 0x376   : > { %3441 = vst [vmem:[#allocation14_spill] sm:$0xff] %v3044_v5  ;;  %v1079_v6 = vmax.f32 %v3042_v1, %v3044_v5 }
 0x378   : > { %1080 = vmax.xlane.f32.xlu1 %v1079_v6  ;;  %v3048_v9 = vpop.f32.mrb[66].mxu1 }
 0x379   : > { %3442 = vst [vmem:[#allocation15_spill] sm:$0xff] %v3048_v9  ;;  %v3050_v21 = vpop.f32.mrb[67].mxu1 }
 0x37a   : > { %3443 = vst [vmem:[#allocation16_spill] sm:$0xff] %v3050_v21  ;;  %v1082_v34 = vmax.f32 %v3048_v9, %v3050_v21 }
 0x37c   : > { %1083 = vmax.xlane.f32.xlu0 %v1082_v34  ;;  %v3054_v35 = vpop.f32.mrb[68].mxu1 }
 0x37d   : > { %3444 = vst [vmem:[#allocation17_spill] sm:$0xff] %v3054_v35  ;;  %v3056_v43 = vpop.f32.mrb[69].mxu1 }
 0x37e   : > { %3445 = vst [vmem:[#allocation18_spill] sm:$0xff] %v3056_v43  ;;  %v1085_v55 = vmax.f32 %v3054_v35, %v3056_v43 }
 0x380   : > { %1086 = vmax.xlane.f32.xlu1 %v1085_v55  ;;  %v3060_v62 = vpop.f32.mrb[70].mxu1 }
 0x381   : > { %3446 = vst [vmem:[#allocation19_spill] sm:$0xff] %v3060_v62  ;;  %v3062_v5 = vpop.f32.mrb[71].mxu1 }
 0x382   : > { %3447 = vst [vmem:[#allocation20_spill] sm:$0xff] %v3062_v5  ;;  %v1088_v6 = vmax.f32 %v3060_v62, %v3062_v5 }
 0x384   : > { %1089 = vmax.xlane.f32.xlu0 %v1088_v6  ;;  %v3066_v1 = vpop.f32.mrb[72].mxu1 }
 0x385   : > { %v3068_v21 = vpop.f32.mrb[73].mxu1 }
 0x386   : > { %3448 = vst [vmem:[#allocation21_spill] sm:$0xff] %v3068_v21  ;;  %v1091_v34 = vmax.f32 %v3066_v1, %v3068_v21 }
 0x388   : > { %1092 = vmax.xlane.f32.xlu1 %v1091_v34 }
 0x399   : > { %v1000_v9 = vpop.xlane.xlu0 %999 }
 0x39a   : > { %v1094_v43 = vsub.f32 %v2880_v11, %v1000_v9  ;;  %v1095_v55 = vsub.f32 %v2882_v14, %v1000_v9 }
 0x39c   : > { %v1158_v35 = vmul.f32 1.442695, %v1094_v43  ;;  %v1160_v12 = vmul.f32 1.442695, %v1095_v55 }
 0x39d   : > { %v1003_v58 = vpop.xlane.xlu1 %1002 }
 0x39e   : > { %2285 = vpow2.f32 %v1158_v35  ;;  %v1096_v5 = vsub.f32 %v2886_v18, %v1003_v58  ;;  %v1097_v6 = vsub.f32 %v2888_v19, %v1003_v58 }
 0x39f   : > { %2287 = vpow2.f32 %v1160_v12 }
 0x3a0   : > { %v1162_v62 = vmul.f32 1.442695, %v1096_v5  ;;  %v1164_v52 = vmul.f32 1.442695, %v1097_v6 }
 0x3a1   : > { %v1006_v48 = vpop.xlane.xlu0 %1005 }
 0x3a2   : > { %2289 = vpow2.f32 %v1162_v62  ;;  %v1098_v34 = vsub.f32 %v2892_v29, %v1006_v48  ;;  %v1099_v21 = vsub.f32 %v2894_v3, %v1006_v48 }
 0x3a3   : > { %2291 = vpow2.f32 %v1164_v52 }
 0x3a4   : > { %v1166_v11 = vmul.f32 1.442695, %v1098_v34  ;;  %v1168_v14 = vmul.f32 1.442695, %v1099_v21 }
 0x3a5   : > { %v1009_v9 = vpop.xlane.xlu1 %1008 }
 0x3a6   : > { %2293 = vpow2.f32 %v1166_v11  ;;  %v1100_v35 = vsub.f32 %v2898_v22, %v1009_v9  ;;  %v1101_v18 = vsub.f32 %v2900_v23, %v1009_v9 }
 0x3a7   : > { %2295 = vpow2.f32 %v1168_v14 }
 0x3a8   : > { %v2286_v19 = vpop.eup %2285  ;;  %v1170_v58 = vmul.f32 1.442695, %v1100_v35  ;;  %v1172_v12 = vmul.f32 1.442695, %v1101_v18 }
 0x3a9   : > { %v2288_v5 = vpop.eup %2287  ;;  %v1012_v43 = vpop.xlane.xlu0 %1011 }
 0x3aa   : > { %2297 = vpow2.f32 %v1170_v58  ;;  %1446 = vmatprep.mubr.f32.mxu0 %v2288_v5  ;;  %v1102_v29 = vsub.f32 %v2904_v27, %v1012_v43  ;;  %v1103_v3 = vsub.f32 %v2906_v28, %v1012_v43  ;;  %v3082_v48 = vadd.f32 %v2288_v5, %v2286_v19 }
 0x3ab   : > { %2299 = vpow2.f32 %v1172_v12  ;;  %1447 = vmatmul.mubr.f32.vlgmr.msra.gmra.mrb[14].mxu0 %v2286_v19 }
 0x3ac   : > { %v2290_v52 = vpop.eup %2289  ;;  %v1174_v22 = vmul.f32 1.442695, %v1102_v29  ;;  %v1176_v21 = vmul.f32 1.442695, %v1103_v3 }
 0x3ad   : > { %v2292_v23 = vpop.eup %2291  ;;  %v1015_v62 = vpop.xlane.xlu1 %1014 }
 0x3ae   : > { %2301 = vpow2.f32 %v1174_v22  ;;  %v1104_v55 = vsub.f32 %v2910_v31, %v1015_v62  ;;  %v1105_v6 = vsub.f32 %v2912_v30, %v1015_v62  ;;  %1451 = vmatprep.mubr.f32.mxu0 %v2292_v23  ;;  %v3086_v34 = vadd.f32 %v2292_v23, %v2290_v52 }
 0x3af   : > { %2303 = vpow2.f32 %v1176_v21  ;;  %1452 = vmatmul.mubr.f32.gmra.mrb[16].mxu0 %v2290_v52 }
 0x3b0   : > { %v2294_v27 = vpop.eup %2293  ;;  %v1178_v28 = vmul.f32 1.442695, %v1104_v55  ;;  %v1180_v11 = vmul.f32 1.442695, %v1105_v6 }
 0x3b1   : > { %v2296_v14 = vpop.eup %2295  ;;  %v1018_v9 = vpop.xlane.xlu0 %1017 }
 0x3b2   : > { %2305 = vpow2.f32 %v1178_v28  ;;  %1456 = vmatprep.mubr.f32.mxu0 %v2296_v14  ;;  %v1106_v35 = vsub.f32 %v2916_v32, %v1018_v9  ;;  %v1107_v18 = vsub.f32 %v2918_v44, %v1018_v9  ;;  %v3090_v19 = vadd.f32 %v2296_v14, %v2294_v27 }
 0x3b3   : > { %2307 = vpow2.f32 %v1180_v11  ;;  %1457 = vmatmul.mubr.f32.gmra.mrb[18].mxu0 %v2294_v27 }
 0x3b4   : > { %v2298_v31 = vpop.eup %2297  ;;  %v1182_v30 = vmul.f32 1.442695, %v1106_v35  ;;  %v1184_v58 = vmul.f32 1.442695, %v1107_v18 }
 0x3b5   : > { %v2300_v12 = vpop.eup %2299  ;;  %v1021_v5 = vpop.xlane.xlu1 %1020 }
 0x3b6   : > { %2309 = vpow2.f32 %v1182_v30  ;;  %v1108_v43 = vsub.f32 %v2922_v41, %v1021_v5  ;;  %v1109_v29 = vsub.f32 %v2924_v33, %v1021_v5  ;;  %1461 = vmatprep.mubr.f32.mxu0 %v2300_v12  ;;  %v3094_v3 = vadd.f32 %v2300_v12, %v2298_v31 }
 0x3b7   : > { %2311 = vpow2.f32 %v1184_v58  ;;  %1462 = vmatmul.mubr.f32.gmra.mrb[20].mxu0 %v2298_v31 }
 0x3b8   : > { %v2302_v32 = vpop.eup %2301  ;;  %v1186_v44 = vmul.f32 1.442695, %v1108_v43  ;;  %v1188_v52 = vmul.f32 1.442695, %v1109_v29 }
 0x3b9   : > { %v2304_v22 = vpop.eup %2303  ;;  %v1024_v21 = vpop.xlane.xlu0 %1023 }
 0x3ba   : > { %2313 = vpow2.f32 %v1186_v44  ;;  %1466 = vmatprep.mubr.f32.mxu0 %v2304_v22  ;;  %v1110_v23 = vsub.f32 %v2928_v37, %v1024_v21  ;;  %v1111_v62 = vsub.f32 %v2930_v17, %v1024_v21  ;;  %v3098_v55 = vadd.f32 %v2304_v22, %v2302_v32 }
 0x3bb   : > { %2315 = vpow2.f32 %v1188_v52  ;;  %1467 = vmatmul.mubr.f32.gmra.mrb[22].mxu0 %v2302_v32 }
 0x3bc   : > { %v2306_v41 = vpop.eup %2305  ;;  %v1190_v33 = vmul.f32 1.442695, %v1110_v23  ;;  %v1192_v6 = vmul.f32 1.442695, %v1111_v62 }
 0x3bd   : > { %v2308_v27 = vpop.eup %2307  ;;  %v1027_v28 = vpop.xlane.xlu1 %1026 }
 0x3be   : > { %2317 = vpow2.f32 %v1190_v33  ;;  %v1112_v11 = vsub.f32 %v2934_v38, %v1027_v28  ;;  %v1113_v14 = vsub.f32 %v2936_v49, %v1027_v28  ;;  %1471 = vmatprep.mubr.f32.mxu0 %v2308_v27  ;;  %v3102_v9 = vadd.f32 %v2308_v27, %v2306_v41 }
 0x3bf   : > { %2319 = vpow2.f32 %v1192_v6  ;;  %1472 = vmatmul.mubr.f32.gmra.mrb[24].mxu0 %v2306_v41 }
 0x3c0   : > { %v2310_v37 = vpop.eup %2309  ;;  %v1194_v17 = vmul.f32 1.442695, %v1112_v11  ;;  %v1196_v35 = vmul.f32 1.442695, %v1113_v14 }
 0x3c1   : > { %v2312_v18 = vpop.eup %2311  ;;  %v1030_v31 = vpop.xlane.xlu0 %1029 }
 0x3c2   : > { %2321 = vpow2.f32 %v1194_v17  ;;  %1476 = vmatprep.mubr.f32.mxu0 %v2312_v18  ;;  %v1114_v30 = vsub.f32 %v2940_v46, %v1030_v31  ;;  %v1115_v58 = vsub.f32 %v2942_v42, %v1030_v31  ;;  %v3106_v12 = vadd.f32 %v2312_v18, %v2310_v37 }
 0x3c3   : > { %2323 = vpow2.f32 %v1196_v35  ;;  %1477 = vmatmul.mubr.f32.gmra.mrb[26].mxu0 %v2310_v37 }
 0x3c4   : > { %v2314_v38 = vpop.eup %2313  ;;  %v1198_v49 = vmul.f32 1.442695, %v1114_v30  ;;  %v1200_v5 = vmul.f32 1.442695, %v1115_v58 }
 0x3c5   : > { %v2316_v43 = vpop.eup %2315  ;;  %v1033_v29 = vpop.xlane.xlu1 %1032 }
 0x3c6   : > { %2325 = vpow2.f32 %v1198_v49  ;;  %v1116_v32 = vsub.f32 %v2946_v45, %v1033_v29  ;;  %v1117_v44 = vsub.f32 %v2948_v47, %v1033_v29  ;;  %1481 = vmatprep.mubr.f32.mxu0 %v2316_v43  ;;  %v3110_v52 = vadd.f32 %v2316_v43, %v2314_v38 }
 0x3c7   : > { %2327 = vpow2.f32 %v1200_v5  ;;  %1482 = vmatmul.mubr.f32.gmra.mrb[28].mxu0 %v2314_v38 }
 0x3c8   : > { %v2318_v46 = vpop.eup %2317  ;;  %v1202_v42 = vmul.f32 1.442695, %v1116_v32  ;;  %v1204_v22 = vmul.f32 1.442695, %v1117_v44 }
 0x3c9   : > { %v2320_v21 = vpop.eup %2319  ;;  %v1036_v23 = vpop.xlane.xlu0 %1035 }
 0x3ca   : > { %2329 = vpow2.f32 %v1202_v42  ;;  %1486 = vmatprep.mubr.f32.mxu0 %v2320_v21  ;;  %v1118_v62 = vsub.f32 %v2952_v50, %v1036_v23  ;;  %v1119_v41 = vsub.f32 %v2954_v51, %v1036_v23  ;;  %v3114_v33 = vadd.f32 %v2320_v21, %v2318_v46 }
 0x3cb   : > { %2331 = vpow2.f32 %v1204_v22  ;;  %1487 = vmatmul.mubr.f32.gmra.mrb[30].mxu0 %v2318_v46 }
 0x3cc   : > { %v2322_v45 = vpop.eup %2321  ;;  %v1206_v47 = vmul.f32 1.442695, %v1118_v62  ;;  %v1208_v6 = vmul.f32 1.442695, %v1119_v41 }
 0x3cd   : > { %v2324_v27 = vpop.eup %2323  ;;  %v1039_v28 = vpop.xlane.xlu1 %1038 }
 0x3ce   : > { %2333 = vpow2.f32 %v1206_v47  ;;  %v1120_v11 = vsub.f32 %v2958_v53, %v1039_v28  ;;  %v1121_v14 = vsub.f32 %v2960_v54, %v1039_v28  ;;  %1491 = vmatprep.mubr.f32.mxu0 %v2324_v27  ;;  %v3118_v37 = vadd.f32 %v2324_v27, %v2322_v45 }
 0x3cf   : > { %2335 = vpow2.f32 %v1208_v6  ;;  %1492 = vmatmul.mubr.f32.gmra.mrb[32].mxu0 %v2322_v45 }
 0x3d0   : > { %v2326_v50 = vpop.eup %2325  ;;  %v1210_v51 = vmul.f32 1.442695, %v1120_v11  ;;  %v1212_v17 = vmul.f32 1.442695, %v1121_v14 }
 0x3d1   : > { %v2328_v35 = vpop.eup %2327  ;;  %v1042_v18 = vpop.xlane.xlu0 %1041 }
 0x3d2   : > { %2337 = vpow2.f32 %v1210_v51  ;;  %1496 = vmatprep.mubr.f32.mxu0 %v2328_v35  ;;  %v1122_v31 = vsub.f32 %v2964_v56, %v1042_v18  ;;  %v1123_v30 = vsub.f32 %v2966_v57, %v1042_v18  ;;  %v3122_v58 = vadd.f32 %v2328_v35, %v2326_v50 }
 0x3d3   : > { %2339 = vpow2.f32 %v1212_v17  ;;  %1497 = vmatmul.mubr.f32.gmra.mrb[34].mxu0 %v2326_v50 }
 0x3d4   : > { %v2330_v53 = vpop.eup %2329  ;;  %v1214_v54 = vmul.f32 1.442695, %v1122_v31  ;;  %v1216_v38 = vmul.f32 1.442695, %v1123_v30 }
 0x3d5   : > { %v2332_v49 = vpop.eup %2331  ;;  %v1045_v5 = vpop.xlane.xlu1 %1044 }
 0x3d6   : > { %2341 = vpow2.f32 %v1214_v54  ;;  %v1124_v43 = vsub.f32 %v2970_v59, %v1045_v5  ;;  %v1125_v29 = vsub.f32 %v2972_v15, %v1045_v5  ;;  %1501 = vmatprep.mubr.f32.mxu0 %v2332_v49  ;;  %v3126_v32 = vadd.f32 %v2332_v49, %v2330_v53 }
 0x3d7   : > { %2343 = vpow2.f32 %v1216_v38  ;;  %1502 = vmatmul.mubr.f32.gmra.mrb[36].mxu0 %v2330_v53 }
 0x3d8   : > { %v2334_v56 = vpop.eup %2333  ;;  %v1218_v57 = vmul.f32 1.442695, %v1124_v43  ;;  %v1220_v44 = vmul.f32 1.442695, %v1125_v29 }
 0x3d9   : > { %v2336_v46 = vpop.eup %2335  ;;  %v1048_v42 = vpop.xlane.xlu0 %1047 }
 0x3da   : > { %2345 = vpow2.f32 %v1218_v57  ;;  %1506 = vmatprep.mubr.f32.mxu0 %v2336_v46  ;;  %v1126_v22 = vsub.f32 %v2976_v60, %v1048_v42  ;;  %v1127_v21 = vsub.f32 %v2978_v61, %v1048_v42  ;;  %v3130_v23 = vadd.f32 %v2336_v46, %v2334_v56 }
 0x3db   : > { %2347 = vpow2.f32 %v1220_v44  ;;  %1507 = vmatmul.mubr.f32.gmra.mrb[38].mxu0 %v2334_v56 }
 0x3dc   : > { %v2338_v59 = vpop.eup %2337  ;;  %v1222_v15 = vmul.f32 1.442695, %v1126_v22  ;;  %v1224_v62 = vmul.f32 1.442695, %v1127_v21 }
 0x3dd   : > { %v2340_v41 = vpop.eup %2339  ;;  %v1051_v45 = vpop.xlane.xlu1 %1050 }
 0x3de   : > { %2349 = vpow2.f32 %v1222_v15  ;;  %v1128_v47 = vsub.f32 %v2982_v63, %v1051_v45  ;;  %v1129_v6 = vsub.f32 %v2984_v0, %v1051_v45  ;;  %1511 = vmatprep.mubr.f32.mxu0 %v2340_v41  ;;  %v3134_v27 = vadd.f32 %v2340_v41, %v2338_v59 }
 0x3df   : > { %2351 = vpow2.f32 %v1224_v62  ;;  %1512 = vmatmul.mubr.f32.gmra.mrb[40].mxu0 %v2338_v59 }
 0x3e0   : > { %v2342_v60 = vpop.eup %2341  ;;  %v1226_v61 = vmul.f32 1.442695, %v1128_v47  ;;  %v1228_v28 = vmul.f32 1.442695, %v1129_v6 }
 0x3e1   : > { %v2344_v11 = vpop.eup %2343  ;;  %v1054_v14 = vpop.xlane.xlu0 %1053 }
 0x3e2   : > { %2353 = vpow2.f32 %v1226_v61  ;;  %1516 = vmatprep.mubr.f32.mxu0 %v2344_v11  ;;  %v1130_v50 = vsub.f32 %v2988_v2, %v1054_v14  ;;  %v1131_v51 = vsub.f32 %v2990_v4, %v1054_v14  ;;  %v3138_v17 = vadd.f32 %v2344_v11, %v2342_v60 }
 0x3e3   : > { %2355 = vpow2.f32 %v1228_v28  ;;  %1517 = vmatmul.mubr.f32.gmra.mrb[42].mxu0 %v2342_v60 }
 0x3e4   : > { %v2346_v63 = vpop.eup %2345  ;;  %v1230_v0 = vmul.f32 1.442695, %v1130_v50  ;;  %v1232_v35 = vmul.f32 1.442695, %v1131_v51 }
 0x3e5   : > { %v2348_v18 = vpop.eup %2347  ;;  %v1057_v31 = vpop.xlane.xlu1 %1056 }
 0x3e6   : > { %2357 = vpow2.f32 %v1230_v0  ;;  %v1132_v30 = vsub.f32 %v2994_v24, %v1057_v31  ;;  %v1133_v53 = vsub.f32 %v2996_v20, %v1057_v31  ;;  %1521 = vmatprep.mubr.f32.mxu0 %v2348_v18  ;;  %v3142_v54 = vadd.f32 %v2348_v18, %v2346_v63 }
 0x3e7   : > { %2359 = vpow2.f32 %v1232_v35  ;;  %1522 = vmatmul.mubr.f32.gmra.mrb[44].mxu0 %v2346_v63 }
 0x3e8   : > { %v2350_v2 = vpop.eup %2349  ;;  %v1234_v4 = vmul.f32 1.442695, %v1132_v30  ;;  %v1236_v38 = vmul.f32 1.442695, %v1133_v53  ;;  %v3450_v53 = vld [vmem:[#allocation10_spill] sm:$0xff] }
 0x3e9   : > { %v2352_v49 = vpop.eup %2351  ;;  %v1060_v5 = vpop.xlane.xlu0 %1059 }
 0x3ea   : > { %2361 = vpow2.f32 %v1234_v4  ;;  %1526 = vmatprep.mubr.f32.mxu0 %v2352_v49  ;;  %v1134_v43 = vsub.f32 %v3000_v7, %v1060_v5  ;;  %v1135_v29 = vsub.f32 %v3002_v8, %v1060_v5  ;;  %v1334_v56 = vadd.f32 %v2352_v49, %v2350_v2  ;;  %v3451_v5 = vld [vmem:[#allocation11_spill] sm:$0xff] }
 0x3eb   : > { %2363 = vpow2.f32 %v1236_v38  ;;  %1527 = vmatmul.mubr.f32.gmra.mrb[46].mxu0 %v2350_v2 }
 0x3ec   : > { %v2354_v24 = vpop.eup %2353  ;;  %v1238_v20 = vmul.f32 1.442695, %v1134_v43  ;;  %v1240_v57 = vmul.f32 1.442695, %v1135_v29  ;;  %1335 = vadd.xlane.f32.xlu0 %v1334_v56  ;;  %v3452_v29 = vld [vmem:[#allocation12_spill] sm:$0xff] }
 0x3ed   : > { %v2356_v44 = vpop.eup %2355  ;;  %v1063_v46 = vpop.xlane.xlu1 %1062 }
 0x3ee   : > { %2365 = vpow2.f32 %v1238_v20  ;;  %v1136_v42 = vsub.f32 %v3006_v10, %v1063_v46  ;;  %v1137_v22 = vsub.f32 %v3008_v16, %v1063_v46  ;;  %1531 = vmatprep.mubr.f32.mxu0 %v2356_v44  ;;  %v1337_v21 = vadd.f32 %v2356_v44, %v2354_v24 }
 0x3ef   : > { %2367 = vpow2.f32 %v1240_v57  ;;  %1532 = vmatmul.mubr.f32.gmra.mrb[48].mxu0 %v2354_v24 }
 0x3f0   : > { %v2358_v7 = vpop.eup %2357  ;;  %v1242_v8 = vmul.f32 1.442695, %v1136_v42  ;;  %v1244_v59 = vmul.f32 1.442695, %v1137_v22  ;;  %1338 = vadd.xlane.f32.xlu1 %v1337_v21  ;;  %1287 = vadd.xlane.f32.xlu0 %v3082_v48  ;;  %v3454_v21 = vld [vmem:[#allocation14_spill] sm:$0xff] }
 0x3f1   : > { %v2360_v15 = vpop.eup %2359  ;;  %v1066_v62 = vpop.xlane.xlu0 %1065 }
 0x3f2   : > { %2369 = vpow2.f32 %v1242_v8  ;;  %1536 = vmatprep.mubr.f32.mxu0 %v2360_v15  ;;  %v1138_v41 = vsub.f32 %v3012_v26, %v1066_v62  ;;  %v1139_v10 = vsub.f32 %v3014_v25, %v1066_v62  ;;  %v1340_v45 = vadd.f32 %v2360_v15, %v2358_v7 }
 0x3f3   : > { %2371 = vpow2.f32 %v1244_v59  ;;  %1537 = vmatmul.mubr.f32.gmra.mrb[50].mxu0 %v2358_v7 }
 0x3f4   : > { %v2362_v16 = vpop.eup %2361  ;;  %v1246_v47 = vmul.f32 1.442695, %v1138_v41  ;;  %v1248_v6 = vmul.f32 1.442695, %v1139_v10  ;;  %1290 = vadd.xlane.f32.xlu1 %v3086_v34  ;;  %1341 = vadd.xlane.f32.xlu0 %v1340_v45  ;;  %v3455_v10 = vld [vmem:[#allocation15_spill] sm:$0xff] }
 0x3f5   : > { %v2364_v60 = vpop.eup %2363  ;;  %v1069_v61 = vpop.xlane.xlu1 %1068 }
 0x3f6   : > { %2373 = vpow2.f32 %v1246_v47  ;;  %v1140_v48 = vsub.f32 %v3018_v39, %v1069_v61  ;;  %v1141_v28 = vsub.f32 %v3020_v36, %v1069_v61  ;;  %1541 = vmatprep.mubr.f32.mxu0 %v2364_v60  ;;  %v1343_v26 = vadd.f32 %v2364_v60, %v2362_v16 }
 0x3f7   : > { %2375 = vpow2.f32 %v1248_v6  ;;  %1542 = vmatmul.mubr.f32.gmra.mrb[52].mxu0 %v2362_v16  ;;  %v3456_v16 = vld [vmem:[#allocation16_spill] sm:$0xff] }
 0x3f8   : > { %v2366_v25 = vpop.eup %2365  ;;  %v1250_v11 = vmul.f32 1.442695, %v1140_v48  ;;  %v1252_v14 = vmul.f32 1.442695, %v1141_v28  ;;  %1344 = vadd.xlane.f32.xlu1 %v1343_v26  ;;  %1293 = vadd.xlane.f32.xlu0 %v3090_v19  ;;  %v3449_v19 = vld [vmem:[#allocation9_spill] sm:$0xff] }
 0x3f9   : > { %v2368_v50 = vpop.eup %2367  ;;  %v1072_v34 = vpop.xlane.xlu0 %1071 }
 0x3fa   : > { %2377 = vpow2.f32 %v1250_v11  ;;  %1546 = vmatprep.mubr.f32.mxu0 %v2368_v50  ;;  %v1142_v51 = vsub.f32 %v3024_v13, %v1072_v34  ;;  %v1143_v39 = vsub.f32 %v3026_v40, %v1072_v34  ;;  %v1346_v63 = vadd.f32 %v2368_v50, %v2366_v25  ;;  %v3458_v11 = vld [vmem:[#allocation18_spill] sm:$0xff] }
 0x3fb   : > { %2379 = vpow2.f32 %v1252_v14  ;;  %1547 = vmatmul.mubr.f32.gmra.mrb[54].mxu0 %v2366_v25 }
 0x3fc   : > { %v2370_v36 = vpop.eup %2369  ;;  %v1254_v0 = vmul.f32 1.442695, %v1142_v51  ;;  %v1256_v35 = vmul.f32 1.442695, %v1143_v39  ;;  %1296 = vadd.xlane.f32.xlu1 %v3094_v3  ;;  %1347 = vadd.xlane.f32.xlu0 %v1346_v63 }
 0x3fd   : > { %v2372_v18 = vpop.eup %2371  ;;  %v1075_v31 = vpop.xlane.xlu1 %1074 }
 0x3fe   : > { %2381 = vpow2.f32 %v1254_v0  ;;  %v1144_v30 = vsub.f32 %v3449_v19, %v1075_v31  ;;  %v1145_v2 = vsub.f32 %v3450_v53, %v1075_v31  ;;  %1551 = vmatprep.mubr.f32.mxu0 %v2372_v18  ;;  %v1349_v13 = vadd.f32 %v2372_v18, %v2370_v36 }
 0x3ff   : > { %2383 = vpow2.f32 %v1256_v35  ;;  %1552 = vmatmul.mubr.f32.gmra.mrb[56].mxu0 %v2370_v36  ;;  %v3459_v36 = vld [vmem:[#allocation19_spill] sm:$0xff]  ;;  %v3460_v35 = vld [vmem:[#allocation20_spill] sm:$0xff] }
 0x400   : > { %v2374_v40 = vpop.eup %2373  ;;  %v1258_v4 = vmul.f32 1.442695, %v1144_v30  ;;  %v1260_v38 = vmul.f32 1.442695, %v1145_v2  ;;  %1350 = vadd.xlane.f32.xlu1 %v1349_v13  ;;  %1299 = vadd.xlane.f32.xlu0 %v3098_v55  ;;  %v3453_v55 = vld [vmem:[#allocation13_spill] sm:$0xff] }
 0x401   : > { %v2376_v49 = vpop.eup %2375  ;;  %v1078_v3 = vpop.xlane.xlu0 %1077 }
 0x402   : > { %2385 = vpow2.f32 %v1258_v4  ;;  %1556 = vmatprep.mubr.f32.mxu0 %v2376_v49  ;;  %v1146_v43 = vsub.f32 %v3451_v5, %v1078_v3  ;;  %v1147_v56 = vsub.f32 %v3452_v29, %v1078_v3  ;;  %v1352_v24 = vadd.f32 %v2376_v49, %v2374_v40 }
 0x403   : > { %2387 = vpow2.f32 %v1260_v38  ;;  %1557 = vmatmul.mubr.f32.gmra.mrb[58].mxu0 %v2374_v40  ;;  %v3461_v40 = vld [vmem:[#allocation21_spill] sm:$0xff] }
 0x404   : > { %v2378_v20 = vpop.eup %2377  ;;  %v1262_v57 = vmul.f32 1.442695, %v1146_v43  ;;  %v1264_v44 = vmul.f32 1.442695, %v1147_v56  ;;  %1302 = vadd.xlane.f32.xlu1 %v3102_v9  ;;  %1353 = vadd.xlane.f32.xlu0 %v1352_v24 }
 0x405   : > { %v2380_v46 = vpop.eup %2379  ;;  %v1081_v42 = vpop.xlane.xlu1 %1080 }
 0x406   : > { %2389 = vpow2.f32 %v1262_v57  ;;  %v1148_v22 = vsub.f32 %v3453_v55, %v1081_v42  ;;  %v1149_v7 = vsub.f32 %v3454_v21, %v1081_v42  ;;  %1561 = vmatprep.mubr.f32.mxu0 %v2380_v46  ;;  %v1355_v8 = vadd.f32 %v2380_v46, %v2378_v20  ;;  %v3189_v21 = vld [vmem:[%s2693_s6] sm:$0xf] }
 0x407   : > { %2391 = vpow2.f32 %v1264_v44  ;;  %1562 = vmatmul.mubr.f32.gmra.mrb[60].mxu0 %v2378_v20  ;;  %2108 = vmatprep.mubr.msk.f32.mxu1 %vm644_vm2, %v3189_v21 }
 0x408   : > { %v2382_v59 = vpop.eup %2381  ;;  %v1266_v15 = vmul.f32 1.442695, %v1148_v22  ;;  %v1268_v62 = vmul.f32 1.442695, %v1149_v7  ;;  %1356 = vadd.xlane.f32.xlu1 %v1355_v8  ;;  %1305 = vadd.xlane.f32.xlu0 %v3106_v12  ;;  %v3457_v12 = vld [vmem:[#allocation17_spill] sm:$0xff] }
 0x409   : > { %v2384_v41 = vpop.eup %2383  ;;  %v1084_v9 = vpop.xlane.xlu0 %1083 }
 0x40a   : > { %2393 = vpow2.f32 %v1266_v15  ;;  %1566 = vmatprep.mubr.f32.mxu0 %v2384_v41  ;;  %v1150_v45 = vsub.f32 %v3455_v10, %v1084_v9  ;;  %v1151_v47 = vsub.f32 %v3456_v16, %v1084_v9  ;;  %v1358_v6 = vadd.f32 %v2384_v41, %v2382_v59 }
 0x40b   : > { %2395 = vpow2.f32 %v1268_v62  ;;  %1567 = vmatmul.mubr.f32.gmra.mrb[62].mxu0 %v2382_v59 }
 0x40c   : > { %v2386_v60 = vpop.eup %2385  ;;  %v1270_v61 = vmul.f32 1.442695, %v1150_v45  ;;  %v1272_v48 = vmul.f32 1.442695, %v1151_v47  ;;  %1308 = vadd.xlane.f32.xlu1 %v3110_v52  ;;  %1359 = vadd.xlane.f32.xlu0 %v1358_v6 }
 0x40d   : > { %v2388_v28 = vpop.eup %2387  ;;  %v1087_v26 = vpop.xlane.xlu1 %1086 }
 0x40e   : > { %2397 = vpow2.f32 %v1270_v61  ;;  %v1152_v25 = vsub.f32 %v3457_v12, %v1087_v26  ;;  %v1153_v14 = vsub.f32 %v3458_v11, %v1087_v26  ;;  %1571 = vmatprep.mubr.f32.mxu0 %v2388_v28  ;;  %v1361_v50 = vadd.f32 %v2388_v28, %v2386_v60 }
 0x40f   : > { %2399 = vpow2.f32 %v1272_v48  ;;  %1572 = vmatmul.mubr.f32.gmra.mrb[64].mxu0 %v2386_v60 }
 0x410   : > { %v2390_v34 = vpop.eup %2389  ;;  %v1274_v51 = vmul.f32 1.442695, %v1152_v25  ;;  %v1276_v39 = vmul.f32 1.442695, %v1153_v14  ;;  %1362 = vadd.xlane.f32.xlu1 %v1361_v50  ;;  %1311 = vadd.xlane.f32.xlu0 %v3114_v33 }
 0x411   : > { %v2392_v63 = vpop.eup %2391  ;;  %v1090_v52 = vpop.xlane.xlu0 %1089 }
 0x412   : > { %2401 = vpow2.f32 %v1274_v51  ;;  %1576 = vmatprep.mubr.f32.mxu0 %v2392_v63  ;;  %v1154_v0 = vsub.f32 %v3459_v36, %v1090_v52  ;;  %v1155_v18 = vsub.f32 %v3460_v35, %v1090_v52  ;;  %v1364_v31 = vadd.f32 %v2392_v63, %v2390_v34 }
 0x413   : > { %2403 = vpow2.f32 %v1276_v39  ;;  %1577 = vmatmul.mubr.f32.gmra.mrb[66].mxu0 %v2390_v34 }
 0x414   : > { %v2394_v19 = vpop.eup %2393  ;;  %v1278_v30 = vmul.f32 1.442695, %v1154_v0  ;;  %v1280_v53 = vmul.f32 1.442695, %v1155_v18  ;;  %1314 = vadd.xlane.f32.xlu1 %v3118_v37  ;;  %1365 = vadd.xlane.f32.xlu0 %v1364_v31 }
 0x415   : > { %v2396_v2 = vpop.eup %2395  ;;  %v1093_v13 = vpop.xlane.xlu1 %1092 }
 0x416   : > { %2405 = vpow2.f32 %v1278_v30  ;;  %v1156_v33 = vsub.f32 %v3066_v1, %v1093_v13  ;;  %v1157_v4 = vsub.f32 %v3461_v40, %v1093_v13  ;;  %1581 = vmatprep.mubr.f32.mxu0 %v2396_v2  ;;  %v1367_v38 = vadd.f32 %v2396_v2, %v2394_v19 }
 0x417   : > { %2407 = vpow2.f32 %v1280_v53  ;;  %1582 = vmatmul.mubr.f32.gmra.mrb[68].mxu0 %v2394_v19 }
 0x418   : > { %v2398_v49 = vpop.eup %2397  ;;  %v1282_v3 = vmul.f32 1.442695, %v1156_v33  ;;  %v1284_v5 = vmul.f32 1.442695, %v1157_v4  ;;  %1368 = vadd.xlane.f32.xlu1 %v1367_v38  ;;  %1317 = vadd.xlane.f32.xlu0 %v3122_v58 }
 0x419   : > { %v2400_v43 = vpop.eup %2399 }
 0x41a   : > { %2409 = vpow2.f32 %v1282_v3  ;;  %1586 = vmatprep.mubr.f32.mxu0 %v2400_v43  ;;  %v1370_v37 = vadd.f32 %v2400_v43, %v2398_v49 }
 0x41b   : > { %2411 = vpow2.f32 %v1284_v5  ;;  %1587 = vmatmul.mubr.f32.gmra.mrb[70].mxu0 %v2398_v49 }
 0x41c   : > { %v2402_v29 = vpop.eup %2401  ;;  %1320 = vadd.xlane.f32.xlu1 %v3126_v32  ;;  %1371 = vadd.xlane.f32.xlu0 %v1370_v37 }
 0x41d   : > { %v2404_v1 = vpop.eup %2403 }
 0x41e   : > { %1591 = vmatprep.mubr.f32.mxu0 %v2404_v1  ;;  %v1373_v56 = vadd.f32 %v2404_v1, %v2402_v29 }
 0x41f   : > { %1592 = vmatmul.mubr.f32.gmra.mrb[72].mxu0 %v2402_v29 }
 0x420   : > { %v2406_v24 = vpop.eup %2405  ;;  %1374 = vadd.xlane.f32.xlu1 %v1373_v56  ;;  %1323 = vadd.xlane.f32.xlu0 %v3130_v23 }
 0x421   : > { %v2408_v20 = vpop.eup %2407 }
 0x422   : > { %1596 = vmatprep.mubr.f32.mxu0 %v2408_v20  ;;  %v1376_v58 = vadd.f32 %v2408_v20, %v2406_v24 }
 0x423   : > { %1597 = vmatmul.mubr.f32.gmra.mrb[74].mxu0 %v2406_v24 }
 0x424   : > { %v2410_v57 = vpop.eup %2409  ;;  %1326 = vadd.xlane.f32.xlu1 %v3134_v27  ;;  %1377 = vadd.xlane.f32.xlu0 %v1376_v58 }
 0x425   : > { %v2412_v44 = vpop.eup %2411 }
 0x426   : > { %1601 = vmatprep.mubr.f32.mxu0 %v2412_v44  ;;  %v1379_v32 = vadd.f32 %v2412_v44, %v2410_v57 }
 0x427   : > { %1602 = vmatmul.mubr.f32.gmra.mrb[76].mxu0 %v2410_v57 }
 0x428   : > { %1380 = vadd.xlane.f32.xlu1 %v1379_v32  ;;  %1329 = vadd.xlane.f32.xlu0 %v3138_v17 }
 0x42c   : > { %1332 = vadd.xlane.f32.xlu1 %v3142_v54 }
 0x479   : > { %v3184_v46 = vpop.xlane.xlu0 %1335 }
 0x47d   : > { %v3186_v23 = vpop.xlane.xlu1 %1338  ;;  %v1288_v42 = vpop.xlane.xlu0 %1287 }
 0x47e   : > { %v1448_v55 = vpop.f32.mrb[14].mxu0  ;;  %2413 = vrcp.f32 %v1288_v42 }
 0x47f   : > { %v1450_v22 = vpop.f32.mrb[15].mxu0 }
 0x481   : > { %v1291_v27 = vpop.xlane.xlu1 %1290  ;;  %v3191_v7 = vpop.xlane.xlu0 %1341 }
 0x482   : > { %2415 = vrcp.f32 %v1291_v27  ;;  %v1453_v17 = vpop.f32.mrb[16].mxu0 }
 0x483   : > { %v1455_v8 = vpop.f32.mrb[17].mxu0 }
 0x485   : > { %v3195_v54 = vpop.xlane.xlu1 %1344  ;;  %v1294_v59 = vpop.xlane.xlu0 %1293 }
 0x486   : > { %v1458_v15 = vpop.f32.mrb[18].mxu0  ;;  %2417 = vrcp.f32 %v1294_v59 }
 0x487   : > { %v1460_v62 = vpop.f32.mrb[19].mxu0 }
 0x488   : > { %v2414_v10 = vpop.eup %2413 }
 0x489   : > { %v1297_v41 = vpop.xlane.xlu1 %1296  ;;  %v3197_v9 = vpop.xlane.xlu0 %1347  ;;  %v3199_v6 = vmul.f32 %v2414_v10, %v1448_v55 }
 0x48a   : > { %2419 = vrcp.f32 %v1297_v41  ;;  %v1463_v45 = vpop.f32.mrb[20].mxu0 }
 0x48b   : > { %v1465_v16 = vpop.f32.mrb[21].mxu0 }
 0x48c   : > { %v2416_v47 = vpop.eup %2415 }
 0x48d   : > { %v3201_v60 = vmul.f32 %v2416_v47, %v1453_v17  ;;  %v3203_v61 = vpop.xlane.xlu1 %1350  ;;  %v1300_v48 = vpop.xlane.xlu0 %1299 }
 0x48e   : > { %v1468_v28 = vpop.f32.mrb[22].mxu0  ;;  %2421 = vrcp.f32 %v1300_v48 }
 0x48f   : > { %v2129_v26 = vpack.c.bf16 %v3201_v60, %v3199_v6  ;;  %v1470_v12 = vpop.f32.mrb[23].mxu0 }
 0x490   : > { %v2418_v14 = vpop.eup %2417 }
 0x491   : > { %v1303_v25 = vpop.xlane.xlu1 %1302  ;;  %v3207_v11 = vpop.xlane.xlu0 %1353  ;;  %v3209_v39 = vmul.f32 %v2418_v14, %v1458_v15 }
 0x492   : > { %2423 = vrcp.f32 %v1303_v25  ;;  %v1473_v50 = vpop.f32.mrb[24].mxu0 }
 0x493   : > { %v1475_v34 = vpop.f32.mrb[25].mxu0 }
 0x494   : > { %v2420_v51 = vpop.eup %2419 }
 0x495   : > { %v3211_v63 = vmul.f32 %v2420_v51, %v1463_v45  ;;  %v3213_v52 = vpop.xlane.xlu1 %1356  ;;  %v1306_v36 = vpop.xlane.xlu0 %1305 }
 0x496   : > { %v1478_v0 = vpop.f32.mrb[26].mxu0  ;;  %2425 = vrcp.f32 %v1306_v36 }
 0x497   : > { %v2135_v35 = vpack.c.bf16 %v3211_v63, %v3209_v39  ;;  %v1480_v18 = vpop.f32.mrb[27].mxu0 }
 0x498   : > { %v2422_v30 = vpop.eup %2421 }
 0x499   : > { %v1309_v31 = vpop.xlane.xlu1 %1308  ;;  %v3217_v19 = vpop.xlane.xlu0 %1359  ;;  %v3219_v33 = vmul.f32 %v2422_v30, %v1468_v28 }
 0x49a   : > { %2427 = vrcp.f32 %v1309_v31  ;;  %v1483_v53 = vpop.f32.mrb[28].mxu0 }
 0x49b   : > { %v1485_v2 = vpop.f32.mrb[29].mxu0 }
 0x49c   : > { %v2424_v13 = vpop.eup %2423 }
 0x49d   : > { %v3221_v40 = vmul.f32 %v2424_v13, %v1473_v50  ;;  %v3223_v4 = vpop.xlane.xlu1 %1362  ;;  %v1312_v38 = vpop.xlane.xlu0 %1311 }
 0x49e   : > { %v1488_v49 = vpop.f32.mrb[30].mxu0  ;;  %2429 = vrcp.f32 %v1312_v38 }
 0x49f   : > { %v2141_v3 = vpack.c.bf16 %v3221_v40, %v3219_v33  ;;  %v1490_v5 = vpop.f32.mrb[31].mxu0 }
 0x4a0   : > { %v2426_v29 = vpop.eup %2425 }
 0x4a1   : > { %v1315_v43 = vpop.xlane.xlu1 %1314  ;;  %v3227_v37 = vpop.xlane.xlu0 %1365  ;;  %v3229_v20 = vmul.f32 %v2426_v29, %v1478_v0 }
 0x4a2   : > { %2431 = vrcp.f32 %v1315_v43  ;;  %v1493_v1 = vpop.f32.mrb[32].mxu0 }
 0x4a3   : > { %v1495_v56 = vpop.f32.mrb[33].mxu0 }
 0x4a4   : > { %v2428_v24 = vpop.eup %2427 }
 0x4a5   : > { %v3231_v58 = vmul.f32 %v2428_v24, %v1483_v53  ;;  %v3233_v57 = vpop.xlane.xlu1 %1368  ;;  %v1318_v44 = vpop.xlane.xlu0 %1317 }
 0x4a6   : > { %v1498_v32 = vpop.f32.mrb[34].mxu0  ;;  %2433 = vrcp.f32 %v1318_v44 }
 0x4a7   : > { %v2147_v42 = vpack.c.bf16 %v3231_v58, %v3229_v20  ;;  %v1500_v55 = vpop.f32.mrb[35].mxu0 }
 0x4a8   : > { %v2430_v17 = vpop.eup %2429 }
 0x4a9   : > { %v1321_v22 = vpop.xlane.xlu1 %1320  ;;  %v3237_v27 = vpop.xlane.xlu0 %1371  ;;  %v3239_v62 = vmul.f32 %v2430_v17, %v1488_v49 }
 0x4aa   : > { %2435 = vrcp.f32 %v1321_v22  ;;  %v1503_v8 = vpop.f32.mrb[36].mxu0 }
 0x4ab   : > { %v1505_v59 = vpop.f32.mrb[37].mxu0 }
 0x4ac   : > { %v2432_v15 = vpop.eup %2431  ;;  %v2577_v59 = vmov (!%p2068_p1), 839922192  }
 0x4ad   : > { %v3241_v41 = vmul.f32 %v2432_v15, %v1493_v1  ;;  %v3243_v10 = vpop.xlane.xlu1 %1374  ;;  %v1324_v45 = vpop.xlane.xlu0 %1323 }
 0x4ae   : > { %v1508_v16 = vpop.f32.mrb[38].mxu0  ;;  %2437 = vrcp.f32 %v1324_v45 }
 0x4af   : > { %v2153_v47 = vpack.c.bf16 %v3241_v41, %v3239_v62  ;;  %v1510_v48 = vpop.f32.mrb[39].mxu0 }
 0x4b0   : > { %v2434_v25 = vpop.eup %2433 }
 0x4b1   : > { %v1327_v28 = vpop.xlane.xlu1 %1326  ;;  %v3247_v12 = vpop.xlane.xlu0 %1377  ;;  %v3249_v51 = vmul.f32 %v2434_v25, %v1498_v32 }
 0x4b2   : > { %2439 = vrcp.f32 %v1327_v28  ;;  %v1513_v14 = vpop.f32.mrb[40].mxu0 }
 0x4b3   : > { %v1515_v50 = vpop.f32.mrb[41].mxu0  ;;  %2441 = vrcp.f32 %v3184_v46 }
 0x4b4   : > { %v2436_v34 = vpop.eup %2435  ;;  %2443 = vrcp.f32 %v3186_v23 }
 0x4b5   : > { %v3251_v36 = vmul.f32 %v2436_v34, %v1503_v8  ;;  %v3253_v0 = vpop.xlane.xlu1 %1380  ;;  %v1330_v18 = vpop.xlane.xlu0 %1329 }
 0x4b6   : > { %v1518_v31 = vpop.f32.mrb[42].mxu0  ;;  %2445 = vrcp.f32 %v1330_v18 }
 0x4b7   : > { %v2159_v30 = vpack.c.bf16 %v3251_v36, %v3249_v51  ;;  %v1520_v53 = vpop.f32.mrb[43].mxu0 }
 0x4b8   : > { %v2438_v13 = vpop.eup %2437 }
 0x4b9   : > { %v1333_v2 = vpop.xlane.xlu1 %1332  ;;  %v3259_v43 = vmul.f32 %v2438_v13, %v1508_v16 }
 0x4ba   : > { %2447 = vrcp.f32 %v1333_v2  ;;  %v1523_v38 = vpop.f32.mrb[44].mxu0 }
 0x4bb   : > { %v1525_v49 = vpop.f32.mrb[45].mxu0  ;;  %2449 = vrcp.f32 %v3191_v7 }
 0x4bc   : > { %v2440_v5 = vpop.eup %2439  ;;  %2451 = vrcp.f32 %v3195_v54 }
 0x4bd   : > { %v3261_v29 = vmul.f32 %v2440_v5, %v1513_v14  ;;  %v2442_v56 = vpop.eup %2441  ;;  %2453 = vrcp.f32 %v3197_v9 }
 0x4be   : > { %v1528_v1 = vpop.f32.mrb[46].mxu0  ;;  %v2444_v24 = vpop.eup %2443  ;;  %2455 = vrcp.f32 %v3203_v61 }
 0x4bf   : > { %v2165_v46 = vpack.c.bf16 %v3261_v29, %v3259_v43  ;;  %v1530_v23 = vpop.f32.mrb[47].mxu0  ;;  %v1655_v55 = vmul.f32 %v2442_v56, %v1528_v1  ;;  %2457 = vrcp.f32 %v3207_v11  ;;  %v1672_v29 = vld [vmem:[#allocation2] sm:$0xff] }
 0x4c0   : > { %v2446_v44 = vpop.eup %2445  ;;  %2459 = vrcp.f32 %v3213_v52 }
 0x4c1   : > { %v3273_v7 = vmul.f32 %v2446_v44, %v1518_v31  ;;  %2461 = vrcp.f32 %v3217_v19 }
 0x4c2   : > { %v1533_v32 = vpop.f32.mrb[48].mxu0  ;;  %2463 = vrcp.f32 %v3223_v4 }
 0x4c3   : > { %v1656_v22 = vmul.f32 %v2444_v24, %v1533_v32  ;;  %v1535_v17 = vpop.f32.mrb[49].mxu0  ;;  %2465 = vrcp.f32 %v3227_v37 }
 0x4c4   : > { %v2448_v8 = vpop.eup %2447  ;;  %2467 = vrcp.f32 %v3233_v57 }
 0x4c5   : > { %v3275_v15 = vmul.f32 %v2448_v8, %v1523_v38  ;;  %v2126_v45 = vpack.c.bf16 %v1656_v22, %v1655_v55  ;;  %v2450_v28 = vpop.eup %2449  ;;  %2469 = vrcp.f32 %v3237_v27 }
 0x4c6   : > { %v1538_v16 = vpop.f32.mrb[50].mxu0  ;;  %v2452_v25 = vpop.eup %2451  ;;  %2471 = vrcp.f32 %v3243_v10 }
 0x4c7   : > { %v2171_v54 = vpack.c.bf16 %v3275_v15, %v3273_v7  ;;  %v1540_v48 = vpop.f32.mrb[51].mxu0  ;;  %2128 = vmatprep.subr.msk.bf16.mxu1 %vm3269_vm3, %v2126_v45  ;;  %v1657_v50 = vmul.f32 %v2450_v28, %v1538_v16  ;;  %v2454_v6 = vpop.eup %2453  ;;  %2473 = vrcp.f32 %v3247_v12  ;;  %v1854_v7 = vld [vmem:[%s3413_s3] sm:$0xf] (!%p2068_p1)  ;;  %v2576_v15 = vmov (!%p2068_p1), 0  }
 0x4c8   : > { %2131 = vmatpush3.bf16.xpose.msk.msra.mxu1 %vm3269_vm3, %v2129_v26  ;;  %v2456_v60 = vpop.eup %2455  ;;  %2475 = vrcp.f32 %v3253_v0  ;;  %2477 = vset.pattern.permute.xlu0 (!%p2068_p1), %v2576_v15 }
 0x4c9   : > { %v2458_v39 = vpop.eup %2457  ;;  %1857 = vperm.xlu0 (!%p2068_p1), %2477, %v1854_v7  }
 0x4ca   : > { %v1543_v14 = vpop.f32.mrb[52].mxu0  ;;  %v2460_v63 = vpop.eup %2459 }
 0x4cb   : > { %v1658_v9 = vmul.f32 %v2452_v25, %v1543_v14  ;;  %v1545_v34 = vpop.f32.mrb[53].mxu0  ;;  %v2462_v33 = vpop.eup %2461 }
 0x4cc   : > { %v2464_v40 = vpop.eup %2463 }
 0x4cd   : > { %v2132_v18 = vpack.c.bf16 %v1658_v9, %v1657_v50  ;;  %v2466_v20 = vpop.eup %2465 }
 0x4ce   : > { %v1548_v31 = vpop.f32.mrb[54].mxu0  ;;  %v2468_v58 = vpop.eup %2467 }
 0x4cf   : > { %v1550_v53 = vpop.f32.mrb[55].mxu0  ;;  %2134 = vmatprep.subr.msk.bf16.mxu1 %vm3269_vm3, %v2132_v18  ;;  %v1659_v26 = vmul.f32 %v2454_v6, %v1548_v31  ;;  %v2470_v62 = vpop.eup %2469 }
 0x4d0   : > { %2137 = vmatpush3.bf16.xpose.msk.msra.mxu1 %vm3269_vm3, %v2135_v35  ;;  %v2472_v41 = vpop.eup %2471 }
 0x4d1   : > { %v2474_v51 = vpop.eup %2473 }
 0x4d2   : > { %v1553_v61 = vpop.f32.mrb[56].mxu0  ;;  %v2476_v36 = vpop.eup %2475 }
 0x4d3   : > { %v1660_v2 = vmul.f32 %v2456_v60, %v1553_v61  ;;  %v1555_v13 = vpop.f32.mrb[57].mxu0 }
 0x4d5   : > { %v2138_v38 = vpack.c.bf16 %v1660_v2, %v1659_v26 }
 0x4d6   : > { %v1558_v11 = vpop.f32.mrb[58].mxu0 }
 0x4d7   : > { %v1560_v49 = vpop.f32.mrb[59].mxu0  ;;  %2140 = vmatprep.subr.msk.bf16.mxu1 %vm3269_vm3, %v2138_v38  ;;  %v1661_v35 = vmul.f32 %v2458_v39, %v1558_v11 }
 0x4d8   : > { %2143 = vmatpush3.bf16.xpose.msk.msra.mxu1 %vm3269_vm3, %v2141_v3 }
 0x4da   : > { %v1563_v52 = vpop.f32.mrb[60].mxu0 }
 0x4db   : > { %v1662_v5 = vmul.f32 %v2460_v63, %v1563_v52  ;;  %v1565_v1 = vpop.f32.mrb[61].mxu0 }
 0x4dd   : > { %v2144_v23 = vpack.c.bf16 %v1662_v5, %v1661_v35 }
 0x4de   : > { %v1568_v19 = vpop.f32.mrb[62].mxu0 }
 0x4df   : > { %v1570_v56 = vpop.f32.mrb[63].mxu0  ;;  %2146 = vmatprep.subr.msk.bf16.mxu1 %vm3269_vm3, %v2144_v23  ;;  %v1663_v3 = vmul.f32 %v2462_v33, %v1568_v19 }
 0x4e0   : > { %2149 = vmatpush3.bf16.xpose.msk.msra.mxu1 %vm3269_vm3, %v2147_v42 }
 0x4e2   : > { %v1573_v4 = vpop.f32.mrb[64].mxu0 }
 0x4e3   : > { %v1664_v24 = vmul.f32 %v2464_v40, %v1573_v4  ;;  %v1575_v44 = vpop.f32.mrb[65].mxu0 }
 0x4e5   : > { %v2150_v32 = vpack.c.bf16 %v1664_v24, %v1663_v3 }
 0x4e6   : > { %v1578_v37 = vpop.f32.mrb[66].mxu0 }
 0x4e7   : > { %v1580_v55 = vpop.f32.mrb[67].mxu0  ;;  %2152 = vmatprep.subr.msk.bf16.mxu1 %vm3269_vm3, %v2150_v32  ;;  %v1665_v42 = vmul.f32 %v2466_v20, %v1578_v37 }
 0x4e8   : > { %2155 = vmatpush3.bf16.xpose.msk.msra.mxu1 %vm3269_vm3, %v2153_v47 }
 0x4ea   : > { %v1583_v57 = vpop.f32.mrb[68].mxu0 }
 0x4eb   : > { %v1666_v22 = vmul.f32 %v2468_v58, %v1583_v57  ;;  %v1585_v17 = vpop.f32.mrb[69].mxu0 }
 0x4ed   : > { %v2156_v8 = vpack.c.bf16 %v1666_v22, %v1665_v42 }
 0x4ee   : > { %v1588_v27 = vpop.f32.mrb[70].mxu0 }
 0x4ef   : > { %v1590_v45 = vpop.f32.mrb[71].mxu0  ;;  %2158 = vmatprep.subr.msk.bf16.mxu1 %vm3269_vm3, %v2156_v8  ;;  %v1667_v47 = vmul.f32 %v2470_v62, %v1588_v27 }
 0x4f0   : > { %2161 = vmatpush3.bf16.xpose.msk.msra.mxu1 %vm3269_vm3, %v2159_v30 }
 0x4f2   : > { %v1593_v10 = vpop.f32.mrb[72].mxu0 }
 0x4f3   : > { %v1668_v16 = vmul.f32 %v2472_v41, %v1593_v10  ;;  %v1595_v48 = vpop.f32.mrb[73].mxu0 }
 0x4f5   : > { %v2162_v28 = vpack.c.bf16 %v1668_v16, %v1667_v47 }
 0x4f6   : > { %v1598_v12 = vpop.f32.mrb[74].mxu0 }
 0x4f7   : > { %v1600_v25 = vpop.f32.mrb[75].mxu0  ;;  %2164 = vmatprep.subr.msk.bf16.mxu1 %vm3269_vm3, %v2162_v28  ;;  %v1669_v30 = vmul.f32 %v2474_v51, %v1598_v12 }
 0x4f8   : > { %2167 = vmatpush3.bf16.xpose.msk.msra.mxu1 %vm3269_vm3, %v2165_v46 }
 0x4fa   : > { %v1603_v0 = vpop.f32.mrb[76].mxu0 }
 0x4fb   : > { %v1670_v14 = vmul.f32 %v2476_v36, %v1603_v0  ;;  %v1605_v50 = vpop.f32.mrb[77].mxu0 }
 0x4fd   : > { %v2168_v9 = vpack.c.bf16 %v1670_v14, %v1669_v30 }
 0x4ff   : > { %2170 = vmatprep.subr.msk.bf16.mxu1 %vm3269_vm3, %v2168_v9 }
 0x500   : > { %2173 = vmatpush3.bf16.xpose.msk.msra.mxu1 %vm3269_vm3, %v2171_v54  ;;  %v1860_v54 = vunpack.c.l.s4 (!%p2068_p1), %v2577_v59 }
 0x502   : > { %v1861_v31 = vunpack.c.0.s8 (!%p2068_p1), %v1860_v54 }
 0x507   : > { %2109 = vmatmul.mubr.msk.f32.vlgmr.msra.gmra.mrb[74].mxu1 %vm644_vm2, %v3189_v21  ;;  %v1862_v21 = vlaneseq (!%p2068_p1) }
 0x509   : > { %v1863_v53 = vshrl.u32 (!%p2068_p1), %v1862_v21, 7 }
 0x50b   : > { %v1864_v6 = vsub.s32 (!%p2068_p1), %v1861_v31, %v1863_v53 }
 0x548   : > { %v1858_v60 = vpop.permute.xlu0 (!%p2068_p1), %1857 }
 0x549   : > { %v1865_v26 = vrot.slane (!%p2068_p1), %v1858_v60, %v1864_v6 }
 0x5da   : > { %v1838_v43 = vpop.f32.mrb[74].mxu1  ;;  %1852 = sbr.rel (%p2068_p1) target bundleno = 1515 (0x5eb), region = 44 }
 0x5db   : > { %v1840_v46 = vpop.f32.mrb[75].mxu1 }
 0x5dc   : > { %v1845_v34 = vcombine.low %v1838_v43, %v1840_v46 }
 0x5de   : > { %v1847_v18 = vadd.f32 %v1845_v34, %v1672_v29 }
 0x5e0   : > { %1848 = vst [vmem:[#allocation2] sm:$0xff] %v1847_v18 }
 0x5e7   : > { %v1853_v61 = vld [vmem:[#allocation2] sm:$0xff] }
 0x5e8   : > { %v1867_v2 = vadd.f32 %v1865_v26, %v1853_v61 }
 0x5ea   : > { %1868 = vst [vmem:[%s230_s21] sm:$0xff] %v1867_v2 }
 0x5eb PF: > { %s2075_s18 = sshll.u32 %s2560_s19, 7  ;;  %s1884_s10 = sshll.u32 %s230_s21, 4  ;;  %s1885_s10 = int_to_ptr.vmem [resolvable:$true] %s1884_s10 }
 0x5ec   : > { %s3359_s9 = scalar_lea.hbm %s3414_s4, %s2075_s18  ;;  %s3464_s11 = sand.u32 1, %s2548_s16  }
 0x5ed   : > { %s1870_s12 = scalar_lea.sflag [#allocation4], %s3464_s11  ;;  %s2478_s13 = scalar_lea.vmem %s1885_s10, 128 }
 0x5ee   : > { %p2479_p2 = scmp.ne.s32.totalorder %s1885_s10, %s2478_s13  ;;  %s2578_s14 = smov [#allocation3]  }
 0x5ef   : > { %s2482_s23 = sshll.u32 %s2578_s14, 4  ;;  %s2483_s23 = int_to_ptr.vmem [resolvable:$false] %s2482_s23 }
 0x5f0   : > { %p2480_p4 = pnand %p2479_p2, %p2653_p3  ;;  %s2484_s24 = scalar_lea.vmem %s2483_s23, 256 }
 0x5f1   : > { %p2485_p6 = scmp.lt.s32.totalorder %s1885_s10, %s2483_s23  ;;  %p2486_p7 = scmp.lt.s32.totalorder %s2484_s24, %s2478_s13 }
 0x5f2   : > { %p2481_p5 = pneg %p2480_p4 }
 0x5f3   : > { %p2487_p8 = por %p2486_p7, %p2485_p6 }
 0x5f5   : > { %p2488_p10 = pnand %p2487_p8, %p2481_p5 }
 0x5f7   : > { %2491 = shalt.err (!%p2488_p10)
}
 0x5f8   : > { %s2492_s19 = scalar_lea.hbm %s3359_s9, 128  ;;  %s2496_s29 = scalar_lea.hbm %s3414_s4, 256 }
 0x5f9   : > { %p2493_p11 = scmp.ne.s32.totalorder %s3359_s9, %s2492_s19  ;;  %p2497_p0 = scmp.lt.u32.totalorder %s3359_s9, %s3414_s4 }
 0x5fa   : > { %p2498_p1 = scmp.lt.u32.totalorder %s2496_s29, %s2492_s19  ;;  %p2500_p4 = scmp.lt.u32.totalorder %s2492_s19, %s3359_s9 }
 0x5fb   : > { %p2494_p12 = pnand %p2493_p11, %p2653_p3 }
 0x5fc   : > { %p2499_p2 = por %p2498_p1, %p2497_p0 }
 0x5fd   : > { %p2495_p13 = pneg %p2494_p12 }
 0x5fe   : > { %p2501_p5 = por %p2500_p4, %p2499_p2 }
 0x600   : > { %p2502_p6 = pnand %p2501_p5, %p2495_p13 }
 0x602   : > { %2505 = shalt.err (!%p2502_p6)
}
 0x603   : > { %2177 = dma.vmem_to_hbm [thread:$0]  (%p2653_p3), %s1885_s10, 128, %s3359_s9, %s1870_s12  }
 0x604 PF: > { %p2183_p7 = scmp.ge.s32.totalorder %s2572_s22, 2  ;;  %s1896_s26 = sand.u32 1, %s2544_s15  }
 0x605   : > { %s1897_s18 = scalar_lea.sflag [#allocation4], %s1896_s26 }
 0x606   : > { %p2180_p8 = pnand %p2183_p7, %p2663_p9 }
 0x608   : > { %2539 = dma.done.wait (!%p2180_p8), %s1897_s18, 128  }
 0x609   : > { %2541 = vsyncadd (!%p2180_p8), %s1897_s18, 4294967168  ;;  %s17_s22 = sadd.s32 1, %s2572_s22   ;;  %s3465_s19 = sld [smem:[#allocation6_spill]] }
 0x60a   : > { %p14_p10 = scmp.ge.s32.totalorder %s17_s22, 10   ;;  %s3466_s27 = sld [smem:[#allocation7_spill]] }
 0x60b   : > { %s3467_s21 = sld [smem:[#allocation8_spill]]  ;;  %s3468_s15 = smov %s2548_s16 }
 0x60c   : > { %s3469_s16 = smov %s2552_s17  ;;  %s3470_s17 = smov %s2671_s5 }
 0x60d   : > { %s3471_s18 = smov %s2564_s20  ;;  %16 = sbr.rel (!%p14_p10) target bundleno = 5 (0x5), region = 85 }
 0x610   : > { %s3472_s20 = smov %s3466_s27 }
 0x614   :  { %1902 = vsyncpa [#allocation4], 1 }
 0x615   :  { %1904 = vsyncpa [#allocation4 + $0x1], 1 }

</bundles_post_ra>
